<compile_context>
chip_gen: v7x
topology: tpu7x:2x2x1
jax: 0.10.0
libtpu: 0.0.40
codegen_flags: <defaults>
</compile_context>

<pallas_src>
import functools

import jax
import jax.numpy as jnp
from jax import lax
from jax.experimental import pallas as pl
from jax.experimental.pallas import tpu as pltpu


def _afe_kernel(xw_ref,           # (1, 1, 1, tt+128) f32: this tile's audio window
                w1_ref, b1_ref,   # (32, 3) f32, (32, 1) f32
                w2_ref, b2_ref,   # (64, 96) bf16, (64, 1) f32
                w3_ref, b3_ref,   # (128, 192) bf16, (128, 1) f32
                out_ref,          # (1, 1, 128, 128) f32 — per-(core,b) partial sums
                *, tile_t, seq_len, nt_per):
    TT = tile_t
    c = pl.program_id(0)                      # core-split index (v7x T-split)
    i = pl.program_id(2)                      # time-tile index within this split
    t0 = (c * nt_per + i) * TT                # absolute time of first output row

    # Reset the resident accumulator at the start of each (core, batch) sweep.
    @pl.when(i == 0)
    def _():
        out_ref[...] = jnp.zeros_like(out_ref)

    # One lane-iota keep row, reused for all three masks (times [t0-2, t0+TT+2)).
    tpos = lax.broadcasted_iota(jnp.int32, (1, TT + 4), 1) + (t0 - 2)
    keep = jnp.logical_and(tpos >= 0, tpos < seq_len).astype(jnp.float32)  # (1, TT+4)

    # Audio window: xw[m] = audio[time t0 + m - 3] (zero outside [0, T)).
    xw = xw_ref[0, 0]                         # (1, tt+128) f32, lane-aligned load
    x0 = xw[:, 0:TT + 4]                      # tap k=0 -> x[t-1]
    x1 = xw[:, 1:TT + 5]                      # tap k=1 -> x[t]
    x2 = xw[:, 2:TT + 6]                      # tap k=2 -> x[t+1]

    # ---- conv1 (C_in=1): 3 sublane-broadcast VPU FMAs, f32, time on lanes ----
    w1 = w1_ref[...]                          # (32, 3)
    h1 = (x0 * w1[:, 0:1] + x1 * w1[:, 1:2] + x2 * w1[:, 2:3]) + b1_ref[...]
    h1 = jnp.maximum(h1, 0.0) * keep          # (32, TT+4) f32, padded rows zeroed
    h1b = h1.astype(jnp.bfloat16)

    # ---- conv2: fused 3-tap MXU matmul, bf16 operands, f32 accumulate ----
    cat1 = jnp.concatenate(
        [h1b[:, 0:TT + 2], h1b[:, 1:TT + 3], h1b[:, 2:TT + 4]], axis=0)   # (96, TT+2)
    h2 = jnp.dot(w2_ref[...], cat1, preferred_element_type=jnp.float32)
    h2 = jnp.maximum(h2 + b2_ref[...], 0.0) * keep[:, 1:TT + 3]           # (64, TT+2)
    h2b = h2.astype(jnp.bfloat16)

    # ---- conv3: fused 3-tap MXU matmul ----
    cat2 = jnp.concatenate(
        [h2b[:, 0:TT], h2b[:, 1:TT + 1], h2b[:, 2:TT + 2]], axis=0)       # (192, TT)
    h3 = jnp.dot(w3_ref[...], cat2, preferred_element_type=jnp.float32)
    h3 = jnp.maximum(h3 + b3_ref[...], 0.0) * keep[:, 2:TT + 2]           # (128, TT)

    # ---- pooling: fold lane-tiles into the resident (128, 128) accumulator ----
    part = h3[:, 0:128]
    for j in range(1, TT // 128):             # static, lane-tile-aligned slices
        part = part + h3[:, j * 128:(j + 1) * 128]
    out_ref[...] += part[None, None]


# ---------------------------------------------------------------------------
# One-time parameter packing (outside the per-call hot path):
#   conv weights (C_out, C_in, K) -> tap-stacked (C_out, K*C_in), bf16 for MXU.
# ---------------------------------------------------------------------------
def pack_params(p):
    return {
        'w1': p['w1'][:, 0, :].astype(jnp.float32),                       # (32, 3)
        'b1': p['b1'].reshape(32, 1).astype(jnp.float32),
        'w2': jnp.transpose(p['w2'], (0, 2, 1)).reshape(64, 96).astype(jnp.bfloat16),
        'b2': p['b2'].reshape(64, 1).astype(jnp.float32),
        'w3': jnp.transpose(p['w3'], (0, 2, 1)).reshape(128, 192).astype(jnp.bfloat16),
        'b3': p['b3'].reshape(128, 1).astype(jnp.float32),
        'wfc': p['wfc'].astype(jnp.float32),     # FC runs in the wrapper, f32
        'bfc': p['bfc'].astype(jnp.float32),
    }


def audio_feature_extractor(audio, packed, *, tile_t=4096, core_split=None):
    """audio: (B, T) float32, packed: pack_params(...). Returns (B, 128) f32."""
    B, T = audio.shape
    # Lane-aligned time tile (multiple of 128), capped by the rounded-up T.
    tt = max(128, min(int(tile_t), pl.cdiv(T, 128) * 128))
    tt = (tt // 128) * 128
    nt = pl.cdiv(T, tt)

    # v7x: split the T reduction across the 2 TensorCores when batch can't.
    split = (2 if (B == 1 and nt >= 2) else 1) if core_split is None else int(core_split)
    split = max(1, min(split, nt))
    nt_per = pl.cdiv(nt, split)
    nt_pad = split * nt_per

    # Host-side pre-windowing: window i = padded_audio[i*tt : i*tt + tt + 128],
    # so every grid step DMAs one aligned, 128-multiple window (time on lanes).
    W = tt + 128
    xp_len = nt_pad * tt + 128
    xp = jnp.pad(audio.astype(jnp.float32), ((0, 0), (3, xp_len - T - 3)))
    win_idx = (jnp.arange(nt_pad) * tt)[:, None] + jnp.arange(W)[None, :]
    xwin = xp[:, win_idx][:, :, None, :]              # (B, nt_pad, 1, W)

    kernel = functools.partial(_afe_kernel, tile_t=tt, seq_len=T, nt_per=nt_per)

    def wspec(arr):   # small weights/biases: whole array resident in VMEM
        nd = arr.ndim
        return pl.BlockSpec(arr.shape, lambda c, b, i: (0,) * nd)

    out_acc = pl.pallas_call(
        kernel,
        out_shape=jax.ShapeDtypeStruct((split, B, 128, 128), jnp.float32),
        grid=(split, B, nt_per),
        in_specs=[
            pl.BlockSpec((1, 1, 1, W), lambda c, b, i: (b, c * nt_per + i, 0, 0)),
            wspec(packed['w1']), wspec(packed['b1']),
            wspec(packed['w2']), wspec(packed['b2']),
            wspec(packed['w3']), wspec(packed['b3']),
        ],
        out_specs=pl.BlockSpec((1, 1, 128, 128), lambda c, b, i: (c, b, 0, 0)),
        compiler_params=pltpu.CompilerParams(
            dimension_semantics=("parallel", "parallel", "arbitrary"),
            vmem_limit_bytes=64 * 1024 * 1024),
    )(xwin, packed['w1'], packed['b1'], packed['w2'], packed['b2'],
      packed['w3'], packed['b3'])

    # mean over time + Linear(128,128) in the wrapper (M=B matmul, f32).
    pooled = out_acc.sum(axis=(0, 3)) * (1.0 / T)          # (B, 128)
    return pooled @ packed['wfc'].T + packed['bfc'][None, :]


# ---------------------------------------------------------------------------
# Deterministic synthetic parameters (shapes match the nn.Module __init__).
# ---------------------------------------------------------------------------
def init_params(key):
    ks = jax.random.split(key, 8)
    s = 0.1
    return {
        'w1': jax.random.normal(ks[0], (32, 1, 3), jnp.float32) * s,
        'b1': jax.random.normal(ks[1], (32,), jnp.float32) * s,
        'w2': jax.random.normal(ks[2], (64, 32, 3), jnp.float32) * s,
        'b2': jax.random.normal(ks[3], (64,), jnp.float32) * s,
        'w3': jax.random.normal(ks[4], (128, 64, 3), jnp.float32) * s,
        'b3': jax.random.normal(ks[5], (128,), jnp.float32) * s,
        'wfc': jax.random.normal(ks[6], (128, 128), jnp.float32) * s,
        'bfc': jax.random.normal(ks[7], (128,), jnp.float32) * s,
    }


# Pure-JAX f32 reference mirroring the PyTorch forward exactly.
def reference_forward(audio, p):
    x = audio[:, None, :]                                 # (B, 1, T)
    for w, b in ((p['w1'], p['b1']), (p['w2'], p['b2']), (p['w3'], p['b3'])):
        x = lax.conv_general_dilated(
            x, w, window_strides=(1,), padding=((1, 1),),
            dimension_numbers=('NCH', 'OIH', 'NCH'))
        x = jnp.maximum(x + b[None, :, None], 0.0)
    feat = x.mean(axis=2)                                 # (B, 128)
    return feat @ p['wfc'].T + p['bfc'][None, :]


if __name__ == "__main__":
    key = jax.random.PRNGKey(0)
    k_a1, k_a2, k_params = jax.random.split(key, 3)
    params = init_params(k_params)
    packed = pack_params(params)

    # Case 1: B=2, T=300, tile_t=128 -> grid (1, 2, 3): exercises batch
    # parallelism, multi-tile accumulation and both sequence boundaries.
    audio1 = jax.random.normal(k_a1, (2, 300), jnp.float32)
    out1 = jax.block_until_ready(audio_feature_extractor(audio1, packed, tile_t=128))
    ref1 = reference_forward(audio1, params)
    assert out1.shape == (2, 128)
    assert jnp.allclose(out1, ref1, atol=3e-2, rtol=3e-2), \
        f"case1 max abs err {float(jnp.max(jnp.abs(out1 - ref1)))}"

    # Case 2: B=1, T=200, tile_t=128 -> grid (2, 1, 1): exercises the two-core
    # time-split path (split=2) with a masked tail tile.
    audio2 = jax.random.normal(k_a2, (1, 200), jnp.float32)
    out2 = jax.block_until_ready(audio_feature_extractor(audio2, packed, tile_t=128))
    ref2 = reference_forward(audio2, params)
    assert out2.shape == (1, 128)
    assert jnp.allclose(out2, ref2, atol=3e-2, rtol=3e-2), \
        f"case2 max abs err {float(jnp.max(jnp.abs(out2 - ref2)))}"

    print("KERNEL_OK")
</pallas_src>

<mosaic_0001>
module attributes {stable_mosaic.version = 11 : i64} {
  func.func @_afe_kernel(%arg0: i32, %arg1: i32, %arg2: i32, %arg3: memref<1x1x1x256xf32, #tpu.memory_space<vmem>>, %arg4: memref<32x3xf32, #tpu.memory_space<vmem>>, %arg5: memref<32x1xf32, #tpu.memory_space<vmem>>, %arg6: memref<64x96xbf16, #tpu.memory_space<vmem>>, %arg7: memref<64x1xf32, #tpu.memory_space<vmem>>, %arg8: memref<128x192xbf16, #tpu.memory_space<vmem>>, %arg9: memref<128x1xf32, #tpu.memory_space<vmem>>, %arg10: memref<1x1x128x128xf32, #tpu.memory_space<vmem>>) attributes {dimension_semantics = [#tpu.dimension_semantics<parallel>, #tpu.dimension_semantics<parallel>, #tpu.dimension_semantics<arbitrary>], iteration_bounds = array<i64: 1, 2, 3>, scalar_prefetch = 0 : i64, scratch_operands = 0 : i64, tpu.core_type = #tpu.core_type<tc>, window_params = [{transform_indices = @transform_0, window_bounds = array<i64: 1, 1, 1, 256>}, {pipeline_mode = #tpu.pipeline_mode<synchronous>, transform_indices = @transform_1, window_bounds = array<i64: 32, 3>}, {pipeline_mode = #tpu.pipeline_mode<synchronous>, transform_indices = @transform_2, window_bounds = array<i64: 32, 1>}, {pipeline_mode = #tpu.pipeline_mode<synchronous>, transform_indices = @transform_3, window_bounds = array<i64: 64, 96>}, {pipeline_mode = #tpu.pipeline_mode<synchronous>, transform_indices = @transform_4, window_bounds = array<i64: 64, 1>}, {pipeline_mode = #tpu.pipeline_mode<synchronous>, transform_indices = @transform_5, window_bounds = array<i64: 128, 192>}, {pipeline_mode = #tpu.pipeline_mode<synchronous>, transform_indices = @transform_6, window_bounds = array<i64: 128, 1>}, {transform_indices = @transform_7, window_bounds = array<i64: 1, 1, 128, 128>}]} {
    %c3_i32 = arith.constant 3 : i32
    %0 = arith.muli %arg0, %c3_i32 : i32
    %1 = arith.addi %0, %arg2 : i32
    %c128_i32 = arith.constant 128 : i32
    %2 = arith.muli %1, %c128_i32 : i32
    %c0_i32 = arith.constant 0 : i32
    %3 = arith.cmpi eq, %arg2, %c0_i32 : i32
    %4 = arith.extui %3 : i1 to i32
    %c0_i32_0 = arith.constant 0 : i32
    %5 = arith.cmpi ne, %4, %c0_i32_0 : i32
    scf.if %5 {
      %cst_29 = arith.constant 0.000000e+00 : f32
      %78 = vector.broadcast %cst_29 : f32 to vector<1x1x128x128xf32>
      %c0_30 = arith.constant 0 : index
      %c0_31 = arith.constant 0 : index
      %c0_32 = arith.constant 0 : index
      %c0_33 = arith.constant 0 : index
      %79 = vector.load %arg10[%c0_30, %c0_31, %c0_32, %c0_33] : memref<1x1x128x128xf32, #tpu.memory_space<vmem>>, vector<1x1x128x128xf32>
      tpu.vector_store %arg10[%c0_30, %c0_31, %c0_32, %c0_33], %78 {strides = array<i32>} : memref<1x1x128x128xf32, #tpu.memory_space<vmem>>, vector<1x1x128x128xf32>,
    } else {
    }
    %6 = tpu.iota {dimensions = array<i32: 1>} : vector<1x132xi32>
    %c2_i32 = arith.constant 2 : i32
    %7 = arith.subi %2, %c2_i32 : i32
    %8 = vector.broadcast %7 : i32 to vector<1x132xi32>
    %9 = arith.addi %6, %8 : vector<1x132xi32>
    %c0_i32_1 = arith.constant 0 : i32
    %10 = vector.broadcast %c0_i32_1 : i32 to vector<1x132xi32>
    %11 = arith.cmpi sge, %9, %10 : vector<1x132xi32>
    %c300_i32 = arith.constant 300 : i32
    %12 = vector.broadcast %c300_i32 : i32 to vector<1x132xi32>
    %13 = arith.cmpi slt, %9, %12 : vector<1x132xi32>
    %14 = arith.andi %11, %13 : vector<1x132xi1>
    %15 = arith.extui %14 : vector<1x132xi1> to vector<1x132xi32>
    %16 = arith.sitofp %15 : vector<1x132xi32> to vector<1x132xf32>
    %c0 = arith.constant 0 : index
    %c0_2 = arith.constant 0 : index
    %c0_3 = arith.constant 0 : index
    %c0_4 = arith.constant 0 : index
    %17 = vector.load %arg3[%c0, %c0_2, %c0_3, %c0_4] : memref<1x1x1x256xf32, #tpu.memory_space<vmem>>, vector<1x1x1x256xf32>
    %18 = vector.shape_cast %17 : vector<1x1x1x256xf32> to vector<1x256xf32>
    %19 = vector.extract_strided_slice %18 {offsets = [0, 0], sizes = [1, 132], strides = [1, 1]} : vector<1x256xf32> to vector<1x132xf32>
    %20 = vector.extract_strided_slice %18 {offsets = [0, 1], sizes = [1, 132], strides = [1, 1]} : vector<1x256xf32> to vector<1x132xf32>
    %21 = vector.extract_strided_slice %18 {offsets = [0, 2], sizes = [1, 132], strides = [1, 1]} : vector<1x256xf32> to vector<1x132xf32>
    %c0_5 = arith.constant 0 : index
    %c0_6 = arith.constant 0 : index
    %22 = vector.load %arg4[%c0_5, %c0_6] : memref<32x3xf32, #tpu.memory_space<vmem>>, vector<32x3xf32>
    %23 = vector.extract_strided_slice %22 {offsets = [0, 0], sizes = [32, 1], strides = [1, 1]} : vector<32x3xf32> to vector<32x1xf32>
    %24 = vector.broadcast %19 : vector<1x132xf32> to vector<32x132xf32>
    %25 = vector.broadcast %23 : vector<32x1xf32> to vector<32x132xf32>
    %26 = arith.mulf %24, %25 : vector<32x132xf32>
    %27 = vector.extract_strided_slice %22 {offsets = [0, 1], sizes = [32, 1], strides = [1, 1]} : vector<32x3xf32> to vector<32x1xf32>
    %28 = vector.broadcast %20 : vector<1x132xf32> to vector<32x132xf32>
    %29 = vector.broadcast %27 : vector<32x1xf32> to vector<32x132xf32>
    %30 = arith.mulf %28, %29 : vector<32x132xf32>
    %31 = arith.addf %26, %30 : vector<32x132xf32>
    %32 = vector.extract_strided_slice %22 {offsets = [0, 2], sizes = [32, 1], strides = [1, 1]} : vector<32x3xf32> to vector<32x1xf32>
    %33 = vector.broadcast %21 : vector<1x132xf32> to vector<32x132xf32>
    %34 = vector.broadcast %32 : vector<32x1xf32> to vector<32x132xf32>
    %35 = arith.mulf %33, %34 : vector<32x132xf32>
    %36 = arith.addf %31, %35 : vector<32x132xf32>
    %c0_7 = arith.constant 0 : index
    %c0_8 = arith.constant 0 : index
    %37 = vector.load %arg5[%c0_7, %c0_8] : memref<32x1xf32, #tpu.memory_space<vmem>>, vector<32x1xf32>
    %38 = vector.broadcast %37 : vector<32x1xf32> to vector<32x132xf32>
    %39 = arith.addf %36, %38 : vector<32x132xf32>
    %cst = arith.constant 0.000000e+00 : f32
    %40 = vector.broadcast %cst : f32 to vector<32x132xf32>
    %41 = arith.maximumf %39, %40 : vector<32x132xf32>
    %42 = vector.broadcast %16 : vector<1x132xf32> to vector<32x132xf32>
    %43 = arith.mulf %41, %42 : vector<32x132xf32>
    %44 = arith.truncf %43 : vector<32x132xf32> to vector<32x132xbf16>
    %45 = vector.extract_strided_slice %44 {offsets = [0, 0], sizes = [32, 130], strides = [1, 1]} : vector<32x132xbf16> to vector<32x130xbf16>
    %46 = vector.extract_strided_slice %44 {offsets = [0, 1], sizes = [32, 130], strides = [1, 1]} : vector<32x132xbf16> to vector<32x130xbf16>
    %47 = vector.extract_strided_slice %44 {offsets = [0, 2], sizes = [32, 130], strides = [1, 1]} : vector<32x132xbf16> to vector<32x130xbf16>
    %48 = tpu.concatenate %45, %46, %47 in 0 : vector<32x130xbf16>, vector<32x130xbf16>, vector<32x130xbf16> -> vector<96x130xbf16>
    %c0_9 = arith.constant 0 : index
    %c0_10 = arith.constant 0 : index
    %49 = vector.load %arg6[%c0_9, %c0_10] : memref<64x96xbf16, #tpu.memory_space<vmem>>, vector<64x96xbf16>
    %cst_11 = arith.constant dense<0.000000e+00> : vector<64x130xf32>
    %50 = tpu.matmul %49, %48, %cst_11 {dimension_numbers = #tpu.dot_dimension_numbers<[1], [0], [0], [1], [0, 0, 1, 1], [], []>} : vector<64x96xbf16>, vector<96x130xbf16>, vector<64x130xf32> -> vector<64x130xf32>
    %c0_12 = arith.constant 0 : index
    %c0_13 = arith.constant 0 : index
    %51 = vector.load %arg7[%c0_12, %c0_13] : memref<64x1xf32, #tpu.memory_space<vmem>>, vector<64x1xf32>
    %52 = vector.broadcast %51 : vector<64x1xf32> to vector<64x130xf32>
    %53 = arith.addf %50, %52 : vector<64x130xf32>
    %cst_14 = arith.constant 0.000000e+00 : f32
    %54 = vector.broadcast %cst_14 : f32 to vector<64x130xf32>
    %55 = arith.maximumf %53, %54 : vector<64x130xf32>
    %56 = vector.extract_strided_slice %16 {offsets = [0, 1], sizes = [1, 130], strides = [1, 1]} : vector<1x132xf32> to vector<1x130xf32>
    %57 = vector.broadcast %56 : vector<1x130xf32> to vector<64x130xf32>
    %58 = arith.mulf %55, %57 : vector<64x130xf32>
    %59 = arith.truncf %58 : vector<64x130xf32> to vector<64x130xbf16>
    %60 = vector.extract_strided_slice %59 {offsets = [0, 0], sizes = [64, 128], strides = [1, 1]} : vector<64x130xbf16> to vector<64x128xbf16>
    %61 = vector.extract_strided_slice %59 {offsets = [0, 1], sizes = [64, 128], strides = [1, 1]} : vector<64x130xbf16> to vector<64x128xbf16>
    %62 = vector.extract_strided_slice %59 {offsets = [0, 2], sizes = [64, 128], strides = [1, 1]} : vector<64x130xbf16> to vector<64x128xbf16>
    %63 = tpu.concatenate %60, %61, %62 in 0 : vector<64x128xbf16>, vector<64x128xbf16>, vector<64x128xbf16> -> vector<192x128xbf16>
    %c0_15 = arith.constant 0 : index
    %c0_16 = arith.constant 0 : index
    %64 = vector.load %arg8[%c0_15, %c0_16] : memref<128x192xbf16, #tpu.memory_space<vmem>>, vector<128x192xbf16>
    %cst_17 = arith.constant dense<0.000000e+00> : vector<128x128xf32>
    %65 = tpu.matmul %64, %63, %cst_17 {dimension_numbers = #tpu.dot_dimension_numbers<[1], [0], [0], [1], [0, 0, 1, 1], [], []>} : vector<128x192xbf16>, vector<192x128xbf16>, vector<128x128xf32> -> vector<128x128xf32>
    %c0_18 = arith.constant 0 : index
    %c0_19 = arith.constant 0 : index
    %66 = vector.load %arg9[%c0_18, %c0_19] : memref<128x1xf32, #tpu.memory_space<vmem>>, vector<128x1xf32>
    %67 = vector.broadcast %66 : vector<128x1xf32> to vector<128x128xf32>
    %68 = arith.addf %65, %67 : vector<128x128xf32>
    %cst_20 = arith.constant 0.000000e+00 : f32
    %69 = vector.broadcast %cst_20 : f32 to vector<128x128xf32>
    %70 = arith.maximumf %68, %69 : vector<128x128xf32>
    %71 = vector.extract_strided_slice %16 {offsets = [0, 2], sizes = [1, 128], strides = [1, 1]} : vector<1x132xf32> to vector<1x128xf32>
    %72 = vector.broadcast %71 : vector<1x128xf32> to vector<128x128xf32>
    %73 = arith.mulf %70, %72 : vector<128x128xf32>
    %c0_21 = arith.constant 0 : index
    %c0_22 = arith.constant 0 : index
    %c0_23 = arith.constant 0 : index
    %c0_24 = arith.constant 0 : index
    %74 = vector.load %arg10[%c0_21, %c0_22, %c0_23, %c0_24] : memref<1x1x128x128xf32, #tpu.memory_space<vmem>>, vector<1x1x128x128xf32>
    %75 = vector.shape_cast %73 : vector<128x128xf32> to vector<1x1x128x128xf32>
    %76 = arith.addf %74, %75 : vector<1x1x128x128xf32>
    %c0_25 = arith.constant 0 : index
    %c0_26 = arith.constant 0 : index
    %c0_27 = arith.constant 0 : index
    %c0_28 = arith.constant 0 : index
    %77 = vector.load %arg10[%c0_25, %c0_26, %c0_27, %c0_28] : memref<1x1x128x128xf32, #tpu.memory_space<vmem>>, vector<1x1x128x128xf32>
    tpu.vector_store %arg10[%c0_25, %c0_26, %c0_27, %c0_28], %76 {strides = array<i32>} : memref<1x1x128x128xf32, #tpu.memory_space<vmem>>, vector<1x1x128x128xf32>,
    return
  }
  func.func @transform_0(%arg0: i32, %arg1: i32, %arg2: i32) -> (i32, i32, i32, i32) {
    %c3_i32 = arith.constant 3 : i32
    %0 = arith.muli %arg0, %c3_i32 : i32
    %1 = arith.addi %0, %arg2 : i32
    %c0_i32 = arith.constant 0 : i32
    %c0_i32_0 = arith.constant 0 : i32
    %c0_i32_1 = arith.constant 0 : i32
    return %arg1, %1, %c0_i32, %c0_i32_0 : i32, i32, i32, i32
  }
  func.func @transform_1(%arg0: i32, %arg1: i32, %arg2: i32) -> (i32, i32) {
    %c0_i32 = arith.constant 0 : i32
    %c0_i32_0 = arith.constant 0 : i32
    %c0_i32_1 = arith.constant 0 : i32
    return %c0_i32, %c0_i32_0 : i32, i32
  }
  func.func @transform_2(%arg0: i32, %arg1: i32, %arg2: i32) -> (i32, i32) {
    %c0_i32 = arith.constant 0 : i32
    %c0_i32_0 = arith.constant 0 : i32
    %c0_i32_1 = arith.constant 0 : i32
    return %c0_i32, %c0_i32_0 : i32, i32
  }
  func.func @transform_3(%arg0: i32, %arg1: i32, %arg2: i32) -> (i32, i32) {
    %c0_i32 = arith.constant 0 : i32
    %c0_i32_0 = arith.constant 0 : i32
    %c0_i32_1 = arith.constant 0 : i32
    return %c0_i32, %c0_i32_0 : i32, i32
  }
  func.func @transform_4(%arg0: i32, %arg1: i32, %arg2: i32) -> (i32, i32) {
    %c0_i32 = arith.constant 0 : i32
    %c0_i32_0 = arith.constant 0 : i32
    %c0_i32_1 = arith.constant 0 : i32
    return %c0_i32, %c0_i32_0 : i32, i32
  }
  func.func @transform_5(%arg0: i32, %arg1: i32, %arg2: i32) -> (i32, i32) {
    %c0_i32 = arith.constant 0 : i32
    %c0_i32_0 = arith.constant 0 : i32
    %c0_i32_1 = arith.constant 0 : i32
    return %c0_i32, %c0_i32_0 : i32, i32
  }
  func.func @transform_6(%arg0: i32, %arg1: i32, %arg2: i32) -> (i32, i32) {
    %c0_i32 = arith.constant 0 : i32
    %c0_i32_0 = arith.constant 0 : i32
    %c0_i32_1 = arith.constant 0 : i32
    return %c0_i32, %c0_i32_0 : i32, i32
  }
  func.func @transform_7(%arg0: i32, %arg1: i32, %arg2: i32) -> (i32, i32, i32, i32) {
    %c0_i32 = arith.constant 0 : i32
    %c0_i32_0 = arith.constant 0 : i32
    %c0_i32_1 = arith.constant 0 : i32
    return %arg0, %arg1, %c0_i32, %c0_i32_0 : i32, i32, i32, i32
  }
}

</mosaic_0001>

<bundles_post_ra>
// kernel: tpu_custom_call.1
= control target key start
LH: loop header
LB: loop body
LE: loop exit
PB: predicated region body
PF: predicated region fallthrough
CT: control target
= control target key end

     0   :  { %s2958_s0 = inlined_call_operand.hbm [shape: f32[2,3,1,256], index: 0, kind: input, shape index: {}]   ;;  %s2959_s1 = inlined_call_operand.hbm [shape: f32[32,3], index: 1, kind: input, shape index: {}]   ;;  %s2960_s2 = inlined_call_operand.hbm [shape: f32[32,1], index: 2, kind: input, shape index: {}]   ;;  %s2961_s3 = inlined_call_operand.hbm [shape: bf16[64,96], index: 3, kind: input, shape index: {}]   ;;  %s2962_s4 = inlined_call_operand.hbm [shape: f32[64,1], index: 4, kind: input, shape index: {}]   ;;  %s2963_s5 = inlined_call_operand.hbm [shape: bf16[128,192], index: 5, kind: input, shape index: {}]   ;;  %s2964_s6 = inlined_call_operand.hbm [shape: f32[128,1], index: 6, kind: input, shape index: {}]   ;;  %s2965_s7 = inlined_call_operand.hbm [shape: f32[1,2,128,128], index: 7, kind: output, shape index: {}]  }
   0x1   :  { %2979 = sst [smem:[#allocation23_spill]] %s2958_s0 }
   0x2   :  { %2980 = sst [smem:[#allocation24_spill]] %s2959_s1 }
   0x3   :  { %2981 = sst [smem:[#allocation25_spill]] %s2960_s2 }
   0x4   :  { %2982 = sst [smem:[#allocation26_spill]] %s2961_s3 }
   0x5   :  { %2983 = sst [smem:[#allocation27_spill]] %s2962_s4 }
   0x6   :  { %2984 = sst [smem:[#allocation28_spill]] %s2963_s5 }
   0x7   :  { %2985 = sst [smem:[#allocation29_spill]] %s2965_s7 }
   0x8   :  { %12 = vsyncpa [#allocation3], 0 }
   0x9   :  { %14 = vsyncpa [#allocation3 + $0x1], 0 }
   0xa   :  { %15 = vsyncpa [#allocation6], 0 }
   0xb   :  { %16 = vsyncpa [#allocation9], 0 }
   0xc   :  { %17 = vsyncpa [#allocation12], 0 }
   0xd   :  { %18 = vsyncpa [#allocation4], 0 }
   0xe   :  { %20 = vsyncpa [#allocation4 + $0x1], 0  ;;  %s2257_s24 = smov 0   ;;  %s2259_s25 = smov 0  }
   0xf   :  { %s2261_s26 = smov 0   ;;  %s2263_s27 = smov 0  }
  0x10   :  { %s2265_s28 = smov 0   ;;  %s2267_s29 = smov 0  }
  0x11   :  { %s2269_s30 = smov 0   ;;  %s2271_s8 = smov 0  }
  0x12   :  { %s2273_s9 = smov 0   ;;  %s2275_s10 = smov 0  }
  0x13   :  { %s2277_s11 = smov 0  }
  0x14 LB: > { %2986 = sst [smem:[#allocation20_spill]] %s2178_s30  ;;  %s2966_s12 = sadd.s32 4294967295, %s2194_s11   ;;  %s2194_s11 = sphi %s2277_s11, %s26_s11   ;;  %s2190_s10 = sphi %s2275_s10, %s3026_s10   ;;  %s2186_s9 = sphi %s2273_s9, %s3025_s9   ;;  %s2182_s8 = sphi %s2271_s8, %s3024_s8   ;;  %s2178_s30 = sphi %s2269_s30, %s3023_s30   ;;  %s2174_s29 = sphi %s2267_s29, %s3022_s29   ;;  %s2170_s28 = sphi %s2265_s28, %s3021_s28   ;;  %s2166_s27 = sphi %s2263_s27, %s3020_s27   ;;  %s2162_s26 = sphi %s2261_s26, %s3019_s26   ;;  %s2158_s25 = sphi %s2259_s25, %s3018_s25   ;;  %s2154_s24 = sphi %s2257_s24, %s3017_s24  }
  0x15   : > { %2987 = sst [smem:[#allocation21_spill]] %s2182_s8  ;;  %p1553_p0 = scmp.ge.s32.totalorder %s2194_s11, 1 }
  0x16   : > { %p2316_p1 = scmp.eq.s32.totalorder %s2966_s12, 0  ;;  %p236_p2 = scmp.lt.s32.totalorder %s2194_s11, 7 }
  0x17   : > { %s2196_s15 = smov [#allocation5]   ;;  %s2197_s18 = smov [#allocation8]  }
  0x18   : > { %s2988_s13 = scalar_select %p2316_p1, 1, 0 }
  0x19   : > { %p2321_p3 = pnand %p1553_p0, %p236_p2  ;;  %s248_s16 = sshll.u32 %s2196_s15, 4  ;;  %s249_s16 = int_to_ptr.vmem [resolvable:$true] %s248_s16 }
  0x1a   : > { %s274_s19 = sshll.u32 %s2197_s18, 4  ;;  %s2992_s1 = sld [smem:[#allocation24_spill]]  ;;  %s2333_s19 = int_to_ptr.vmem [resolvable:$true] %s274_s19 }
  0x1b   : > { %s2989_s14 = scalar_select %p2321_p3, 1, 0 }
  0x1c   : > { %p1669_p4 = pneg %p2321_p3 }
  0x1d   : > { %2990 = sst [smem:[#allocation22_spill]] %s2989_s14 }
  0x1e   : > { %p2329_p5 = pnand %p1669_p4, %p2316_p1 }
  0x20   : > { %s1862_s22 = scalar_lea.hbm %s2992_s1, 512  ;;  %p2343_p7 = pneg %p2329_p5 }
  0x21   : > { %p1863_p6 = scmp.ne.s32.totalorder %s2992_s1, %s1862_s22  ;;  %p1869_p10 = scmp.lt.u32.totalorder %s1862_s22, %s2992_s1 }
  0x23   : > { %p1865_p8 = pnand %p2343_p7, %p1863_p6 }
  0x25   : > { %p1866_p9 = pneg %p1865_p8 }
  0x27   : > { %p1871_p11 = pnand %p1869_p10, %p1866_p9 }
  0x29   : > { %1874 = shalt.err (!%p1871_p11)
}
  0x2a   : > { %s1875_s20 = scalar_lea.vmem %s249_s16, 512  ;;  %p1883_p2 = scmp.lt.s32.totalorder %s249_s16, %s249_s16 }
  0x2b   : > { %p1876_p12 = scmp.ne.s32.totalorder %s249_s16, %s1875_s20  ;;  %p1884_p4 = scmp.lt.s32.totalorder %s1875_s20, %s1875_s20 }
  0x2d   : > { %p1878_p13 = pnand %p1876_p12, %p2343_p7  ;;  %p1885_p3 = por %p1884_p4, %p1883_p2 }
  0x2f   : > { %p1879_p0 = pneg %p1878_p13 }
  0x31   : > { %p1886_p1 = pnand %p1885_p3, %p1879_p0 }
  0x33   : > { %1889 = shalt.err (!%p1886_p1)
}
  0x34   : > { %s2974_s12 = smov 128   ;;  %s2976_s21 = smov 8  }
  0x35   : > { %1672 = dma.hbm_to_vmem [thread:$0]  (!%p2329_p5), %s2992_s1, 512, %s249_s16, [#allocation6], %s2974_s12, %s2974_s12, %s2976_s21  }
  0x36   : > { %s2994_s3 = sld [smem:[#allocation26_spill]] }
  0x3c   : > { %s1890_s8 = scalar_lea.hbm %s2994_s3, 512 }
  0x3d   : > { %p1891_p1 = scmp.ne.s32.totalorder %s2994_s3, %s1890_s8  ;;  %p1897_p8 = scmp.lt.u32.totalorder %s1890_s8, %s2994_s3 }
  0x3f   : > { %p1893_p3 = pnand %p1891_p1, %p2343_p7 }
  0x41   : > { %p1894_p6 = pneg %p1893_p3 }
  0x43   : > { %p1899_p9 = pnand %p1897_p8, %p1894_p6 }
  0x45   : > { %1902 = shalt.err (!%p1899_p9)
}
  0x46   : > { %s1903_s16 = scalar_lea.vmem %s2333_s19, 512  ;;  %p1911_p13 = scmp.lt.s32.totalorder %s2333_s19, %s2333_s19 }
  0x47   : > { %p1904_p10 = scmp.ne.s32.totalorder %s2333_s19, %s1903_s16  ;;  %p1912_p0 = scmp.lt.s32.totalorder %s1903_s16, %s1903_s16 }
  0x49   : > { %p1906_p11 = pnand %p1904_p10, %p2343_p7  ;;  %p1913_p2 = por %p1912_p0, %p1911_p13 }
  0x4b   : > { %p1907_p12 = pneg %p1906_p11 }
  0x4d   : > { %p1914_p4 = pnand %p1913_p2, %p1907_p12 }
  0x4f   : > { %1917 = shalt.err (!%p1914_p4)
}
  0x50   : > { %s2200_s30 = smov 64   ;;  %s2201_s0 = smov 4  }
  0x51   : > { %1678 = dma.hbm_to_vmem [thread:$0]  (!%p2329_p5), %s2994_s3, 512, %s2333_s19, [#allocation9], %s2200_s30, %s2200_s30, %s2201_s0  }
  0x52   : > { %s2202_s7 = smov [#allocation11]   ;;  %s2203_s23 = smov [#allocation7]  }
  0x53   : > { %s300_s22 = sshll.u32 %s2202_s7, 4  ;;  %s261_s18 = sshll.u32 %s2203_s23, 4  ;;  %s301_s22 = int_to_ptr.vmem [resolvable:$true] %s300_s22  ;;  %s2385_s18 = int_to_ptr.vmem [resolvable:$true] %s261_s18 }
  0x54   : > { %s2995_s5 = sld [smem:[#allocation28_spill]] }
  0x5a   : > { %s1918_s12 = scalar_lea.hbm %s2995_s5, 2048 }
  0x5b   : > { %p1919_p1 = scmp.ne.s32.totalorder %s2995_s5, %s1918_s12  ;;  %p1925_p8 = scmp.lt.u32.totalorder %s1918_s12, %s2995_s5 }
  0x5d   : > { %p1921_p3 = pnand %p1919_p1, %p2343_p7 }
  0x5f   : > { %p1922_p6 = pneg %p1921_p3 }
  0x61   : > { %p1927_p9 = pnand %p1925_p8, %p1922_p6 }
  0x63   : > { %1930 = shalt.err (!%p1927_p9)
}
  0x64   : > { %s1931_s30 = scalar_lea.vmem %s301_s22, 2048  ;;  %p1939_p13 = scmp.lt.s32.totalorder %s301_s22, %s301_s22 }
  0x65   : > { %p1932_p10 = scmp.ne.s32.totalorder %s301_s22, %s1931_s30  ;;  %p1940_p0 = scmp.lt.s32.totalorder %s1931_s30, %s1931_s30 }
  0x67   : > { %p1934_p11 = pnand %p1932_p10, %p2343_p7  ;;  %p1941_p2 = por %p1940_p0, %p1939_p13 }
  0x69   : > { %p1935_p12 = pneg %p1934_p11 }
  0x6b   : > { %p1942_p4 = pnand %p1941_p2, %p1935_p12 }
  0x6d   : > { %1945 = shalt.err (!%p1942_p4)
}
  0x6e   : > { %s2996_s1 = smov 8   ;;  %s2997_s21 = smov 128  }
  0x6f   : > { %1684 = dma.hbm_to_vmem [thread:$0]  (!%p2329_p5), %s2995_s5, 2048, %s301_s22, [#allocation12], %s2997_s21, %s2997_s21, %s2996_s1  }
  0x70   : > { %s2998_s2 = sld [smem:[#allocation25_spill]] }
  0x76   : > { %s1946_s23 = scalar_lea.hbm %s2998_s2, 512 }
  0x77   : > { %p1947_p1 = scmp.ne.s32.totalorder %s2998_s2, %s1946_s23  ;;  %p1953_p8 = scmp.lt.u32.totalorder %s1946_s23, %s2998_s2 }
  0x79   : > { %p1949_p3 = pnand %p1947_p1, %p2343_p7 }
  0x7b   : > { %p1950_p6 = pneg %p1949_p3 }
  0x7d   : > { %p1955_p9 = pnand %p1953_p8, %p1950_p6 }
  0x7f   : > { %1958 = shalt.err (!%p1955_p9)
}
  0x80   : > { %s1959_s22 = scalar_lea.vmem %s2385_s18, 512  ;;  %p1967_p13 = scmp.lt.s32.totalorder %s2385_s18, %s2385_s18 }
  0x81   : > { %p1960_p10 = scmp.ne.s32.totalorder %s2385_s18, %s1959_s22  ;;  %p1968_p0 = scmp.lt.s32.totalorder %s1959_s22, %s1959_s22 }
  0x83   : > { %p1962_p11 = pnand %p1960_p10, %p2343_p7  ;;  %p1969_p2 = por %p1968_p0, %p1967_p13 }
  0x85   : > { %p1963_p12 = pneg %p1962_p11 }
  0x87   : > { %p1970_p4 = pnand %p1969_p2, %p1963_p12 }
  0x89   : > { %1973 = shalt.err (!%p1970_p4)
}
  0x8a   : > { %1675 = dma.hbm_to_vmem [thread:$0]  (!%p2329_p5), %s2998_s2, 512, %s2385_s18, [#allocation6], %s2997_s21, %s2997_s21, %s2996_s1  }
  0x8b   : > { %s2204_s12 = smov [#allocation10]   ;;  %s2205_s7 = smov [#allocation13]  }
  0x8c   : > { %s287_s14 = sshll.u32 %s2204_s12, 4  ;;  %s313_s23 = sshll.u32 %s2205_s7, 4  ;;  %s288_s14 = int_to_ptr.vmem [resolvable:$true] %s287_s14  ;;  %s2434_s23 = int_to_ptr.vmem [resolvable:$true] %s313_s23 }
  0x8d   : > { %s2999_s4 = sld [smem:[#allocation27_spill]] }
  0x93   : > { %s1974_s8 = scalar_lea.hbm %s2999_s4, 1024 }
  0x94   : > { %p1975_p1 = scmp.ne.s32.totalorder %s2999_s4, %s1974_s8  ;;  %p1981_p8 = scmp.lt.u32.totalorder %s1974_s8, %s2999_s4 }
  0x96   : > { %p1977_p3 = pnand %p1975_p1, %p2343_p7 }
  0x98   : > { %p1978_p6 = pneg %p1977_p3 }
  0x9a   : > { %p1983_p9 = pnand %p1981_p8, %p1978_p6 }
  0x9c   : > { %1986 = shalt.err (!%p1983_p9)
}
  0x9d   : > { %s1987_s0 = scalar_lea.vmem %s288_s14, 1024  ;;  %p1995_p13 = scmp.lt.s32.totalorder %s288_s14, %s288_s14 }
  0x9e   : > { %p1988_p10 = scmp.ne.s32.totalorder %s288_s14, %s1987_s0  ;;  %p1996_p0 = scmp.lt.s32.totalorder %s1987_s0, %s1987_s0 }
  0xa0   : > { %p1990_p11 = pnand %p1988_p10, %p2343_p7  ;;  %p1997_p2 = por %p1996_p0, %p1995_p13 }
  0xa2   : > { %p1991_p12 = pneg %p1990_p11 }
  0xa4   : > { %p1998_p4 = pnand %p1997_p2, %p1991_p12 }
  0xa6   : > { %2001 = shalt.err (!%p1998_p4)
}
  0xa7   : > { %1681 = dma.hbm_to_vmem [thread:$0]  (!%p2329_p5), %s2999_s4, 1024, %s288_s14, [#allocation9], %s2997_s21, %s2997_s21, %s2996_s1  }
  0xa8   : > { %s2002_s8 = scalar_lea.hbm %s2964_s6, 2048 }
  0xa9   : > { %p2003_p1 = scmp.ne.s32.totalorder %s2964_s6, %s2002_s8  ;;  %p2009_p8 = scmp.lt.u32.totalorder %s2002_s8, %s2964_s6 }
  0xab   : > { %p2005_p3 = pnand %p2003_p1, %p2343_p7 }
  0xad   : > { %p2006_p6 = pneg %p2005_p3 }
  0xaf   : > { %p2011_p9 = pnand %p2009_p8, %p2006_p6 }
  0xb1   : > { %2014 = shalt.err (!%p2011_p9)
}
  0xb2   : > { %s2015_s14 = scalar_lea.vmem %s2434_s23, 2048  ;;  %p2023_p13 = scmp.lt.s32.totalorder %s2434_s23, %s2434_s23 }
  0xb3   : > { %p2016_p10 = scmp.ne.s32.totalorder %s2434_s23, %s2015_s14  ;;  %p2024_p0 = scmp.lt.s32.totalorder %s2015_s14, %s2015_s14 }
  0xb5   : > { %p2018_p11 = pnand %p2016_p10, %p2343_p7  ;;  %p2025_p2 = por %p2024_p0, %p2023_p13 }
  0xb7   : > { %p2019_p12 = pneg %p2018_p11 }
  0xb9   : > { %p2026_p4 = pnand %p2025_p2, %p2019_p12 }
  0xbb   : > { %2029 = shalt.err (!%p2026_p4)
}
  0xbc   : > { %1687 = dma.hbm_to_vmem [thread:$0]  (!%p2329_p5), %s2964_s6, 2048, %s2434_s23, [#allocation12], %s2997_s21, %s2997_s21, %s2996_s1  }
  0xbd   : > { %s1552_s17 = sadd.s32 4294967294, %s2194_s11   ;;  %s38_s15 = sadd.s32 1, %s2186_s9 }
  0xbe   : > { %p39_p7 = scmp.ge.s32.totalorder %s38_s15, 3  ;;  %s41_s7 = sadd.s32 1, %s2190_s10 }
  0xbf   : > { %s58_s20 = sadd.s32 1, %s2174_s29  ;;  %p65_p1 = scmp.ne.s32.totalorder %s2174_s29, %s2170_s28 }
  0xc0   : > { %s3028_s15 = smov (%p39_p7, %s38_s15), 0  ;;  %s3030_s7 = smov (!%p39_p7, %s41_s7), %s2190_s10 }
  0xc1   : > { %s54_s16 = ssub.s32 %s2186_s9, %s3028_s15  ;;  %p66_p3 = scmp.eq.s32.totalorder %s2194_s11, 0 }
  0xc2   : > { %p43_p5 = scmp.ge.s32.totalorder %s3030_s7, 2  ;;  %p71_p6 = scmp.ne.s32.totalorder %s2170_s28, %s2166_s27 }
  0xc3   : > { %p2497_p8 = por %p66_p3, %p65_p1  ;;  %s212_s21 = sadd.s32 1, %s2162_s26 }
  0xc4   : > { %s3032_s7 = smov (%p43_p5, %s3030_s7), 0  ;;  %p3001_p9 = scmp.ne.s32.totalorder %s2988_s13, 0 }
  0xc5   : > { %p222_p11 = scmp.ne.s32.totalorder %s2162_s26, %s2158_s25  ;;  %s53_s8 = ssub.s32 %s2190_s10, %s3032_s7 }
  0xc6   : > { %p2506_p10 = por %p3001_p9, %p71_p6  ;;  %s3003_s27 = sadd.s32 4294967295, %s2194_s11  }
  0xc7   : > { %p223_p12 = scmp.eq.s32.totalorder %s3003_s27, 5  ;;  %s55_s19 = sor.u32 %s54_s16, %s53_s8 }
  0xc8   : > { %p210_p13 = scmp.eq.s32.totalorder %s53_s8, 0  ;;  %p56_p0 = scmp.eq.s32.totalorder %s55_s19, 0 }
  0xc9   : > { %p2516_p2 = por %p223_p12, %p222_p11  ;;  %p228_p4 = scmp.ne.s32.totalorder %s2158_s25, %s2154_s24 }
  0xca   : > { %s2521_s30 = scalar_select %p210_p13, %s2162_s26, %s212_s21  }
  0xcb   : > { %s3004_s22 = scalar_select %p2516_p2, 1, 0 }
  0xcc   : > { %s2524_s18 = scalar_select %p56_p0, %s2174_s29, %s58_s20  }
  0xcd   : > { %p229_p7 = scmp.eq.s32.totalorder %s1552_s17, 5  ;;  %p1702_p1 = scmp.lt.s32.totalorder %s2194_s11, 6 }
  0xce   : > { %s327_s14 = sand.u32 1, %s2174_s29   ;;  %s1562_s16 = sshll.u32 %s2186_s9, 1 }
  0xcf   : > { %p2530_p3 = por %p229_p7, %p228_p4  ;;  %s1561_s12 = sshll.u32 %s327_s14, 1 }
  0xd0   : > { %s1640_s8 = smul.u32 6, %s2190_s10  ;;  %s331_s27 = scalar_lea.vmem [#allocation2], %s1561_s12 }
  0xd1   : > { %s3005_s0 = scalar_select %p2530_p3, 1, 0 }
  0xd2   : > { %s343_s19 = sshll.u32 %s331_s27, 4  ;;  %p2538_p5 = pnand %p1702_p1, %p2497_p8  ;;  %s2542_s19 = int_to_ptr.vmem [resolvable:$true] %s343_s19 }
  0xd3   : > { %s339_s20 = sadd.s32 %s1640_s8, %s1562_s16  ;;  %s3007_s4 = sld [smem:[#allocation23_spill]] }
  0xd4   : > { %s1563_s17 = sshll.u32 %s339_s20, 4  ;;  %s328_s1 = scalar_lea.sflag [#allocation3], %s327_s14 }
  0xd5   : > { %p2032_p8 = pneg %p2538_p5 }
  0xd9   : > { %s2547_s5 = scalar_lea.hbm %s3007_s4, %s1563_s17  ;;  %s2035_s27 = scalar_lea.hbm %s3007_s4, 192 }
  0xda   : > { %s2030_s12 = scalar_lea.hbm %s2547_s5, 32  ;;  %p2036_p12 = scmp.lt.u32.totalorder %s2547_s5, %s3007_s4 }
  0xdb   : > { %p2031_p6 = scmp.ne.s32.totalorder %s2547_s5, %s2030_s12  ;;  %p2037_p13 = scmp.lt.u32.totalorder %s2035_s27, %s2030_s12 }
  0xdc   : > { %p2039_p4 = scmp.lt.u32.totalorder %s2030_s12, %s2547_s5 }
  0xdd   : > { %p2033_p9 = pnand %p2032_p8, %p2031_p6  ;;  %p2038_p0 = por %p2037_p13, %p2036_p12 }
  0xdf   : > { %p2034_p11 = pneg %p2033_p9  ;;  %p2040_p7 = por %p2039_p4, %p2038_p0 }
  0xe1   : > { %p2041_p1 = pnand %p2040_p7, %p2034_p11 }
  0xe3   : > { %2044 = shalt.err (!%p2041_p1)
}
  0xe4   : > { %s2045_s14 = scalar_lea.vmem %s2542_s19, 32  ;;  %s2206_s17 = smov [#allocation2]  }
  0xe5   : > { %p2046_p6 = scmp.ne.s32.totalorder %s2542_s19, %s2045_s14  ;;  %s2050_s21 = sshll.u32 %s2206_s17, 4  ;;  %s2051_s21 = int_to_ptr.vmem [resolvable:$false] %s2050_s21 }
  0xe6   : > { %s2052_s16 = scalar_lea.vmem %s2051_s21, 64  ;;  %p2053_p2 = scmp.lt.s32.totalorder %s2542_s19, %s2051_s21 }
  0xe7   : > { %p2048_p9 = pnand %p2046_p6, %p2032_p8  ;;  %p2054_p12 = scmp.lt.s32.totalorder %s2052_s16, %s2045_s14 }
  0xe9   : > { %p2049_p3 = pneg %p2048_p9  ;;  %p2055_p13 = por %p2054_p12, %p2053_p2 }
  0xeb   : > { %p2056_p0 = pnand %p2055_p13, %p2049_p3 }
  0xed   : > { %2059 = shalt.err (!%p2056_p0)
}
  0xee   : > { %1691 = dma.hbm_to_vmem [thread:$0]  (!%p2538_p5), %s2547_s5, 32, %s2542_s19, %s328_s1  }
  0xef   : > { %s3008_s12 = sld [smem:[#allocation22_spill]] }
  0xf5   : > { %p3009_p11 = scmp.ne.s32.totalorder %s3008_s12, 0 }
  0xf6   : > { %s354_s8 = sand.u32 (!%p3009_p11), 1, %s2170_s28  }
  0xf7   : > { %352 = sbr.rel (%p3009_p11) target bundleno = 1350 (0x546), region = 48  ;;  %s2577_s27 = sshll.u32 (!%p3009_p11), %s354_s8, 1 }
  0xf8   : > { %s355_s3 = scalar_lea.sflag (!%p3009_p11), [#allocation3], %s354_s8  ;;  %s358_s20 = scalar_lea.vmem (!%p3009_p11), [#allocation2], %s2577_s27 }
  0xfe   : > { %2133 = dma.done.wait (%p2506_p10), %s355_s3, 32  }
  0xff   : > { %2135 = vsyncadd (%p2506_p10), %s355_s3, 4294967264  ;;  %p3010_p2 = scmp.ne.s32.totalorder %s2988_s13, 0 }
 0x101   : > { %2137 = dma.done.wait (%p3010_p2), [#allocation6], 1024  }
 0x102   : > { %2139 = vsyncadd (%p3010_p2), [#allocation6], 4294966272 }
 0x103   : > { %2141 = dma.done.wait (%p3010_p2), [#allocation9], 1536  }
 0x104   : > { %2143 = vsyncadd (%p3010_p2), [#allocation9], 4294965760 }
 0x105   : > { %2145 = dma.done.wait (%p3010_p2), [#allocation12], 4096  }
 0x106   : > { %2147 = vsyncadd (%p3010_p2), [#allocation12], 4294963200  ;;  %s3011_s2 = sld [smem:[#allocation20_spill]]  ;;  %s410_s5 = sand.u32 1, %s2158_s25  }
 0x107   : > { %s1572_s19 = sshll.u32 %s410_s5, 7 }
 0x108   : > { %s2600_s1 = scalar_lea.vmem [#allocation14], %s1572_s19 }
 0x10c   : > { %s1573_s23 = sshll.u32 %s3011_s2, 7  ;;  %p1574_p10 = scmp.ne.s32.totalorder %s3011_s2, 0 }
 0x10d   : > { %v2207_v0 = vmov (!%p1574_p10), 0.0  }
 0x10e   : > { %422 = sbr.rel (%p1574_p10) target bundleno = 278 (0x116), region = 80  ;;  %423 = vst [vmem:[%s2600_s1] sm:$0xff] (!%p1574_p10), %v2207_v0  ;;  %424 = vst [vmem:[%s2600_s1 + $0x8] sm:$0xff] (!%p1574_p10), %v2207_v0 }
 0x10f   : > { %425 = vst [vmem:[%s2600_s1 + $0x10] sm:$0xff] (!%p1574_p10), %v2207_v0  ;;  %426 = vst [vmem:[%s2600_s1 + $0x18] sm:$0xff] (!%p1574_p10), %v2207_v0 }
 0x110   : > { %427 = vst [vmem:[%s2600_s1 + $0x20] sm:$0xff] (!%p1574_p10), %v2207_v0  ;;  %428 = vst [vmem:[%s2600_s1 + $0x28] sm:$0xff] (!%p1574_p10), %v2207_v0 }
 0x111   : > { %429 = vst [vmem:[%s2600_s1 + $0x30] sm:$0xff] (!%p1574_p10), %v2207_v0  ;;  %430 = vst [vmem:[%s2600_s1 + $0x38] sm:$0xff] (!%p1574_p10), %v2207_v0 }
 0x112   : > { %431 = vst [vmem:[%s2600_s1 + $0x40] sm:$0xff] (!%p1574_p10), %v2207_v0  ;;  %432 = vst [vmem:[%s2600_s1 + $0x48] sm:$0xff] (!%p1574_p10), %v2207_v0 }
 0x113   : > { %433 = vst [vmem:[%s2600_s1 + $0x50] sm:$0xff] (!%p1574_p10), %v2207_v0  ;;  %434 = vst [vmem:[%s2600_s1 + $0x58] sm:$0xff] (!%p1574_p10), %v2207_v0 }
 0x114   : > { %435 = vst [vmem:[%s2600_s1 + $0x60] sm:$0xff] (!%p1574_p10), %v2207_v0  ;;  %436 = vst [vmem:[%s2600_s1 + $0x68] sm:$0xff] (!%p1574_p10), %v2207_v0 }
 0x115   : > { %437 = vst [vmem:[%s2600_s1 + $0x70] sm:$0xff] %v2207_v0  ;;  %438 = vst [vmem:[%s2600_s1 + $0x78] sm:$0xff] %v2207_v0 }
 0x116 PF: > { %v457_v1 = vld [vmem:[#allocation5] sm:$0xff]  ;;  %v2208_v2 = vmov 1   ;;  %v2209_v3 = vmov 2   ;;  %v458_v4 = vld [vmem:[#allocation5 + $0x8] sm:$0xff]  ;;  %v2210_v5 = vmov 0   ;;  %v459_v6 = vld [vmem:[#allocation5 + $0x10] sm:$0xff]  ;;  %v439_v12 = vlaneseq }
 0x117   : > { %1817 = vset.pattern.permute.xlu0 %v2208_v2  ;;  %1818 = vset.pattern.permute.xlu1 %v2209_v3  ;;  %v460_v7 = vld [vmem:[#allocation5 + $0x18] sm:$0xff]  ;;  %v638_v8 = vld [vmem:[#allocation7] sm:$0xff]  ;;  %v640_v9 = vld [vmem:[#allocation7 + $0x10] sm:$0xff]  ;;  %s2211_s13 = smov 127   ;;  %s2212_s14 = smov 126   ;;  %vm548_vm0 = vcmask 1039360  }
 0x118   : > { %501 = vperm.xlu0 %1817, %v457_v1   ;;  %570 = vperm.xlu1 %1818, %v457_v1   ;;  %v639_v10 = vld [vmem:[#allocation7 + $0x8] sm:$0xff]  ;;  %v641_v11 = vld [vmem:[#allocation7 + $0x18] sm:$0xff]  ;;  %v463_v13 = vshrl.u32 %v439_v12, 7  ;;  %v440_v51 = vand.u32 127, %v439_v12  ;;  %s1575_s21 = sadd.s32 4294967294, %s1573_s23  ;;  %vm617_vm1 = vcmask 1031168  }
 0x119   : > { %845 = vmatprep.mubr.bf16.mxu0 %v2210_v5  ;;  %1616 = vmatprep.subr.bf16.mxu1 %v2210_v5  ;;  %v456_v16 = vld [vmem:[%s358_s20] sm:$0x3]  ;;  %v443_v55 = vstv %s1575_s21  ;;  %vm800_vm8 = vcmask 785408   ;;  %vm1175_vm9 = vcmask 523264   ;;  %s3013_s16 = sld [smem:[#allocation21_spill]]  ;;  %s1399_s8 = sshll.u32 %s2600_s1, 4  ;;  %s2891_s8 = int_to_ptr.vmem [resolvable:$true] %s1399_s8 }
 0x11a   : > { %v464_v14 = vsub.s32 0, %v463_v13  ;;  %v468_v15 = vsub.s32 1, %v463_v13  ;;  %v441_v54 = vadd.s32 128, %v440_v51  ;;  %v444_v63 = vadd.s32 %v443_v55, %v440_v51  ;;  %s3014_s20 = sld [smem:[#allocation29_spill]]  ;;  %s2897_s23 = scalar_lea.sflag [#allocation4], %s410_s5 }
 0x11b   : > { %s2060_s19 = scalar_lea.vmem %s2891_s8, 2048  ;;  %p3015_p5 = scmp.ne.s32.totalorder %s3004_s22, 0 }
 0x11c   : > { %505 = vperm.xlu0 %1817, %v458_v4   ;;  %574 = vperm.xlu1 %1818, %v458_v4   ;;  %v2625_v17 = vrot.slane %v456_v16, %v464_v14  ;;  %v2627_v18 = vrot.slane %v456_v16, %v468_v15  ;;  %v445_v61 = vadd.s32 %v443_v55, %v441_v54  ;;  %vm446_vm4 = vcmp.ge.s32.totalorder %v444_v63, 0  ;;  %p2061_p3 = scmp.ne.s32.totalorder %s2891_s8, %s2060_s19 }
 0x11d   : > { %vm448_vm5 = vcmp.lt.s32.totalorder %v444_v63, 300 }
 0x11e   : > { %vm447_vm2 = vcmp.ge.s32.totalorder %v445_v61, 0  ;;  %vm449_vm3 = vcmp.lt.s32.totalorder %v445_v61, 300  ;;  %vm450_vm7 = vmand %vm446_vm4, %vm448_vm5  ;;  %p2062_p8 = pnand %p2061_p3, %p3015_p5 }
 0x11f   : > { %vm451_vm6 = vmand %vm447_vm2, %vm449_vm3  ;;  %s1615_s12 = sshll.u32 %s3013_s16, 11 }
 0x120   : > { %509 = vperm.xlu0 %1817, %v459_v6   ;;  %1819 = vset.pattern.permute.xlu1 %v2208_v2  ;;  %s2889_s2 = scalar_lea.hbm %s3014_s20, %s1615_s12  ;;  %p2063_p4 = pneg %p2062_p8 }
 0x121   : > { %513 = vperm.xlu1 %1819, %v460_v7  }
 0x124   : > { %1820 = vset.pattern.permute.xlu0 %v2209_v3 }
 0x125   : > { %578 = vperm.xlu0 %1820, %v459_v6   ;;  %1821 = vset.pattern.permute.xlu1 %v2209_v3 }
 0x126   : > { %582 = vperm.xlu1 %1821, %v460_v7  }
 0x129   : > { %1823 = vset.pattern.permute.xlu0 %v2210_v5 }
 0x12a   : > { %1822 = vset.pattern.permute.xlu1 %v2210_v5  ;;  %479 = vperm.xlu0 %1823, %v458_v4  }
 0x12b   : > { %474 = vperm.xlu1 %1822, %v457_v1  }
 0x12e   : > { %644 = vperm.xlu0 %1823, %v638_v8  }
 0x12f   : > { %484 = vperm.xlu1 %1822, %v459_v6  }
 0x132   : > { %654 = vperm.xlu0 %1823, %v640_v9  }
 0x133   : > { %489 = vperm.xlu1 %1822, %v460_v7  }
 0x137   : > { %649 = vperm.xlu1 %1822, %v639_v10  }
 0x13b   : > { %659 = vperm.xlu1 %1822, %v641_v11  }
 0x197   : > { %v502_v19 = vpop.permute.xlu0 %501  ;;  %v571_v22 = vpop.permute.xlu1 %570 }
 0x198   : > { %v516_v20 = vmul.f32 %v502_v19, %v2625_v17  ;;  %v517_v21 = vmul.f32 %v502_v19, %v2627_v18  ;;  %v585_v26 = vmul.f32 %v571_v22, %v2625_v17  ;;  %v586_v27 = vmul.f32 %v571_v22, %v2627_v18 }
 0x19a   : > { %534 = vrot.lane.b32.xlu1 %v517_v21, %s2211_s13  ;;  %532 = vrot.lane.b32.xlu0 %v516_v20, %s2211_s13 }
 0x19b   : > { %v506_v23 = vpop.permute.xlu0 %505  ;;  %v575_v28 = vpop.permute.xlu1 %574 }
 0x19c   : > { %v518_v24 = vmul.f32 %v506_v23, %v2625_v17  ;;  %v519_v25 = vmul.f32 %v506_v23, %v2627_v18  ;;  %v587_v29 = vmul.f32 %v575_v28, %v2625_v17  ;;  %v588_v30 = vmul.f32 %v575_v28, %v2627_v18 }
 0x19e   : > { %538 = vrot.lane.b32.xlu1 %v519_v25, %s2211_s13  ;;  %536 = vrot.lane.b32.xlu0 %v518_v24, %s2211_s13 }
 0x19f   : > { %v510_v31 = vpop.permute.xlu0 %509 }
 0x1a0   : > { %v514_v32 = vpop.permute.xlu1 %513  ;;  %v520_v33 = vmul.f32 %v510_v31, %v2625_v17  ;;  %v521_v34 = vmul.f32 %v510_v31, %v2627_v18 }
 0x1a1   : > { %v522_v35 = vmul.f32 %v514_v32, %v2625_v17  ;;  %v523_v36 = vmul.f32 %v514_v32, %v2627_v18 }
 0x1a2   : > { %603 = vrot.lane.b32.xlu1 %v586_v27, %s2212_s14  ;;  %601 = vrot.lane.b32.xlu0 %v585_v26, %s2212_s14  ;;  %v2213_v27 = vmov 0.0  }
 0x1a3   : > { %v2679_v28 = vsel %vm451_vm6, 1.0, %v2213_v27 }
 0x1a4   : > { %v579_v37 = vpop.permute.xlu0 %578 }
 0x1a5   : > { %v589_v38 = vmul.f32 %v579_v37, %v2625_v17  ;;  %v590_v39 = vmul.f32 %v579_v37, %v2627_v18  ;;  %v583_v40 = vpop.permute.xlu1 %582 }
 0x1a6   : > { %607 = vrot.lane.b32.xlu1 %v588_v30, %s2212_s14  ;;  %605 = vrot.lane.b32.xlu0 %v587_v29, %s2212_s14  ;;  %v591_v41 = vmul.f32 %v583_v40, %v2625_v17  ;;  %v592_v42 = vmul.f32 %v583_v40, %v2627_v18  ;;  %v2681_v30 = vsel %vm450_vm7, 1.0, %v2213_v27 }
 0x1a9   : > { %v480_v46 = vpop.permute.xlu0 %479 }
 0x1aa   : > { %542 = vrot.lane.b32.xlu1 %v521_v34, %s2211_s13  ;;  %540 = vrot.lane.b32.xlu0 %v520_v33, %s2211_s13  ;;  %v475_v43 = vpop.permute.xlu1 %474  ;;  %v495_v3 = vmul.f32 %v480_v46, %v2627_v18  ;;  %v494_v8 = vmul.f32 %v480_v46, %v2625_v17 }
 0x1ab   : > { %v493_v58 = vmul.f32 %v475_v43, %v2627_v18  ;;  %v492_v60 = vmul.f32 %v475_v43, %v2625_v17 }
 0x1ad   : > { %v645_v48 = vpop.permute.xlu0 %644 }
 0x1ae   : > { %546 = vrot.lane.b32.xlu1 %v523_v36, %s2211_s13  ;;  %544 = vrot.lane.b32.xlu0 %v522_v35, %s2211_s13  ;;  %v2661_v44 = vpop.permute.xlu1 %484 }
 0x1b1   : > { %v2667_v50 = vpop.permute.xlu0 %654 }
 0x1b2   : > { %611 = vrot.lane.b32.xlu1 %v590_v39, %s2212_s14  ;;  %609 = vrot.lane.b32.xlu0 %v589_v38, %s2212_s14  ;;  %v2663_v45 = vpop.permute.xlu1 %489  ;;  %v497_v38 = vmul.f32 %v2661_v44, %v2627_v18 }
 0x1b3   : > { %v499_v51 = vmul.f32 %v2663_v45, %v2627_v18 }
 0x1b6   : > { %615 = vrot.lane.b32.xlu1 %v592_v42, %s2212_s14  ;;  %613 = vrot.lane.b32.xlu0 %v591_v41, %s2212_s14  ;;  %v650_v47 = vpop.permute.xlu1 %649  ;;  %v496_v41 = vmul.f32 %v2661_v44, %v2625_v17  ;;  %v498_v44 = vmul.f32 %v2663_v45, %v2625_v17 }
 0x1ba   : > { %v2665_v49 = vpop.permute.xlu1 %659 }
 0x20c   : > { %v535_v52 = vpop.permute.xlu1 %534  ;;  %v533_v53 = vpop.permute.xlu0 %532 }
 0x20d   : > { %v549_v59 = vsel %vm548_vm0, %v533_v53, %v535_v52  ;;  %v562_v62 = vadd.f32 %v535_v52, %v493_v58 }
 0x20e   : > { %v561_v0 = vadd.f32 %v549_v59, %v492_v60 }
 0x210   : > { %v539_v56 = vpop.permute.xlu1 %538  ;;  %v537_v57 = vpop.permute.xlu0 %536 }
 0x211   : > { %v550_v4 = vsel %vm548_vm0, %v537_v57, %v539_v56  ;;  %v564_v10 = vadd.f32 %v539_v56, %v495_v3 }
 0x212   : > { %v563_v12 = vadd.f32 %v550_v4, %v494_v8 }
 0x214   : > { %v604_v1 = vpop.permute.xlu1 %603  ;;  %v602_v2 = vpop.permute.xlu0 %601 }
 0x215   : > { %v631_v6 = vadd.f32 %v604_v1, %v562_v62  ;;  %v618_v7 = vsel %vm617_vm1, %v602_v2, %v604_v1 }
 0x216   : > { %v630_v9 = vadd.f32 %v618_v7, %v561_v0 }
 0x217   : > { %v663_v11 = vadd.f32 %v645_v48, %v631_v6 }
 0x218   : > { %v662_v13 = vadd.f32 %v645_v48, %v630_v9  ;;  %v608_v14 = vpop.permute.xlu1 %607  ;;  %v606_v15 = vpop.permute.xlu0 %605 }
 0x219   : > { %v633_v16 = vadd.f32 %v608_v14, %v564_v10  ;;  %v619_v19 = vsel %vm617_vm1, %v606_v15, %v608_v14  ;;  %v671_v21 = vmax.f32 %v663_v11, 0.0  ;;  %v732_v10 = vld [vmem:[#allocation10] sm:$0xff]  ;;  %v735_v11 = vld [vmem:[#allocation10 + $0x18] sm:$0xff]  ;;  %v738_v15 = vld [vmem:[#allocation10 + $0x30] sm:$0xff] }
 0x21a   : > { %v632_v20 = vadd.f32 %v619_v19, %v563_v12  ;;  %v670_v23 = vmax.f32 %v662_v13, 0.0  ;;  %v734_v12 = vld [vmem:[#allocation10 + $0x10] sm:$0xff]  ;;  %v737_v13 = vld [vmem:[#allocation10 + $0x28] sm:$0xff]  ;;  %v736_v14 = vld [vmem:[#allocation10 + $0x20] sm:$0xff] }
 0x21b   : > { %v665_v22 = vadd.f32 %v650_v47, %v633_v16  ;;  %v679_v32 = vmul.f32 %v2679_v28, %v671_v21  ;;  %v2717_v16 = vpack.i.bf16 %v2679_v28, %v2681_v30  ;;  %v739_v19 = vld [vmem:[#allocation10 + $0x38] sm:$0xff] }
 0x21c   : > { %v664_v24 = vadd.f32 %v650_v47, %v632_v20  ;;  %v543_v25 = vpop.permute.xlu1 %542  ;;  %v541_v26 = vpop.permute.xlu0 %540  ;;  %v678_v36 = vmul.f32 %v2681_v30, %v670_v23 }
 0x21d   : > { %v673_v29 = vmax.f32 %v665_v22, 0.0  ;;  %v551_v39 = vsel %vm548_vm0, %v541_v26, %v543_v25  ;;  %v566_v43 = vadd.f32 %v543_v25, %v497_v38 }
 0x21e   : > { %v672_v31 = vmax.f32 %v664_v24, 0.0  ;;  %v565_v46 = vadd.f32 %v551_v39, %v496_v41 }
 0x21f   : > { %v681_v33 = vmul.f32 %v2679_v28, %v673_v29 }
 0x220   : > { %v547_v34 = vpop.permute.xlu1 %546  ;;  %v545_v35 = vpop.permute.xlu0 %544  ;;  %v680_v37 = vmul.f32 %v2681_v30, %v672_v31 }
 0x221   : > { %v687_v40 = vpack.c.bf16 %v681_v33, %v679_v32  ;;  %v552_v52 = vsel %vm548_vm0, %v545_v35, %v547_v34  ;;  %v568_v56 = vadd.f32 %v547_v34, %v499_v51  ;;  %v1834_v32 = vld [vmem:[#allocation8] sm:$0xff]   ;;  %v1835_v33 = vld [vmem:[#allocation8 + $0x8] sm:$0xff]   ;;  %v1836_v34 = vld [vmem:[#allocation8 + $0x10] sm:$0xff]  }
 0x222   : > { %v686_v42 = vpack.c.bf16 %v680_v37, %v678_v36  ;;  %v567_v58 = vadd.f32 %v552_v52, %v498_v44  ;;  %v1837_v35 = vld [vmem:[#allocation8 + $0x18] sm:$0xff]  }
 0x223   : > { %696 = vrot.lane.b32.xlu1 %v687_v40, %s2211_s13  ;;  %813 = vmatprep.subr.bf16.mxu0 %v687_v40 }
 0x224   : > { %v612_v47 = vpop.permute.xlu1 %611  ;;  %v610_v48 = vpop.permute.xlu0 %609  ;;  %694 = vrot.lane.b32.xlu0 %v686_v42, %s2211_s13  ;;  %814 = vmatpush1.bf16.msra.mxu0 %v686_v42 }
 0x225   : > { %v635_v53 = vadd.f32 %v612_v47, %v566_v43  ;;  %v620_v54 = vsel %vm617_vm1, %v610_v48, %v612_v47 }
 0x226   : > { %v634_v55 = vadd.f32 %v620_v54, %v565_v46 }
 0x227   : > { %v667_v57 = vadd.f32 %v2667_v50, %v635_v53 }
 0x228   : > { %v666_v59 = vadd.f32 %v2667_v50, %v634_v55  ;;  %v616_v60 = vpop.permute.xlu1 %615  ;;  %v614_v61 = vpop.permute.xlu0 %613 }
 0x229   : > { %v637_v62 = vadd.f32 %v616_v60, %v568_v56  ;;  %v621_v18 = vsel %vm617_vm1, %v614_v61, %v616_v60  ;;  %v675_v0 = vmax.f32 %v667_v57, 0.0 }
 0x22a   : > { %v636_v63 = vadd.f32 %v621_v18, %v567_v58  ;;  %v674_v2 = vmax.f32 %v666_v59, 0.0 }
 0x22b   : > { %v669_v1 = vadd.f32 %v2665_v49, %v637_v62  ;;  %v683_v4 = vmul.f32 %v2679_v28, %v675_v0 }
 0x22c   : > { %v668_v3 = vadd.f32 %v2665_v49, %v636_v63  ;;  %v682_v50 = vmul.f32 %v2681_v30, %v674_v2  ;;  %v733_v49 = vld [vmem:[#allocation10 + $0x8] sm:$0xff] }
 0x22d   : > { %v677_v17 = vmax.f32 %v669_v1, 0.0 }
 0x22e   : > { %v676_v45 = vmax.f32 %v668_v3, 0.0 }
 0x22f   : > { %v685_v6 = vmul.f32 %v2679_v28, %v677_v17 }
 0x230   : > { %v684_v7 = vmul.f32 %v2681_v30, %v676_v45 }
 0x231   : > { %v689_v8 = vpack.c.bf16 %v685_v6, %v683_v4 }
 0x232   : > { %v688_v9 = vpack.c.bf16 %v684_v7, %v682_v50 }
 0x233   : > { %700 = vrot.lane.b32.xlu1 %v689_v8, %s2211_s13  ;;  %815 = vmatprep.subr.bf16.mxu0 %v689_v8 }
 0x234   : > { %698 = vrot.lane.b32.xlu0 %v688_v9, %s2211_s13  ;;  %816 = vmatpush1.bf16.msra.mxu0 %v688_v9 }
 0x237   : > { %711 = vrot.lane.b32.xlu1 %v687_v40, %s2212_s14 }
 0x238   : > { %709 = vrot.lane.b32.xlu0 %v686_v42, %s2212_s14 }
 0x23b   : > { %715 = vrot.lane.b32.xlu1 %v689_v8, %s2212_s14 }
 0x23c   : > { %713 = vrot.lane.b32.xlu0 %v688_v9, %s2212_s14 }
 0x23f   : > { %747 = vperm.xlu1 %1822, %v733_v49  }
 0x240   : > { %742 = vperm.xlu0 %1823, %v732_v10  }
 0x243   : > { %757 = vperm.xlu1 %1822, %v735_v11  }
 0x244   : > { %752 = vperm.xlu0 %1823, %v734_v12  }
 0x247   : > { %767 = vperm.xlu1 %1822, %v737_v13  }
 0x248   : > { %762 = vperm.xlu0 %1823, %v736_v14  }
 0x24b   : > { %772 = vperm.xlu1 %1822, %v738_v15  }
 0x24c   : > { %1825 = vrot.lane.b32.xlu0 %v2717_v16, %s2211_s13 }
 0x250   : > { %777 = vperm.xlu0 %1823, %v739_v19  }
 0x295   : > { %v697_v20 = vpop.permute.xlu1 %696 }
 0x296   : > { %v695_v21 = vpop.permute.xlu0 %694  ;;  %817 = vmatprep.subr.bf16.mxu0 %v697_v20 }
 0x297   : > { %v703_v22 = vsel %vm548_vm0, %v695_v21, %v697_v20 }
 0x298   : > { %818 = vmatpush1.bf16.msra.mxu0 %v703_v22 }
 0x2a5   : > { %v701_v23 = vpop.permute.xlu1 %700 }
 0x2a6   : > { %v699_v24 = vpop.permute.xlu0 %698  ;;  %819 = vmatprep.subr.bf16.mxu0 %v701_v23 }
 0x2a7   : > { %v704_v25 = vsel %vm548_vm0, %v699_v24, %v701_v23 }
 0x2a8   : > { %820 = vmatpush1.bf16.msra.mxu0 %v704_v25 }
 0x2a9   : > { %v712_v26 = vpop.permute.xlu1 %711 }
 0x2aa   : > { %v710_v27 = vpop.permute.xlu0 %709  ;;  %821 = vmatprep.subr.bf16.mxu0 %v712_v26 }
 0x2ab   : > { %v718_v28 = vsel %vm617_vm1, %v710_v27, %v712_v26 }
 0x2ac   : > { %822 = vmatpush1.bf16.msra.mxu0 %v718_v28 }
 0x2ad   : > { %v716_v29 = vpop.permute.xlu1 %715 }
 0x2ae   : > { %v714_v30 = vpop.permute.xlu0 %713  ;;  %823 = vmatprep.subr.bf16.mxu0 %v716_v29 }
 0x2af   : > { %v719_v31 = vsel %vm617_vm1, %v714_v30, %v716_v29 }
 0x2b0   : > { %824 = vmatpush1.bf16.msra.mxu0 %v719_v31 }
 0x2b1   : > { %1200 = vmatprep.subr.bf16.mxu0 %v2210_v5 }
 0x2b3   : > { %1582 = vmatmul.mubr.msk.bf16.vlgmr.msra.gmra.mrb[0].mxu0 %vm800_vm8, %v1834_v32 }
 0x2b4   : > { %855 = vmatprep.mubr.bf16.mxu0 %v2210_v5 }
 0x2bb   : > { %1583 = vmatmul.mubr.msk.bf16.gmra.mrb[4].mxu0 %vm800_vm8, %v1835_v33 }
 0x2bc   : > { %865 = vmatprep.mubr.bf16.mxu0 %v2210_v5 }
 0x2be   : > { %v748_v47 = vpop.permute.xlu1 %747 }
 0x2bf   : > { %v743_v36 = vpop.permute.xlu0 %742 }
 0x2c2   : > { %v758_v2 = vpop.permute.xlu1 %757 }
 0x2c3   : > { %1584 = vmatmul.mubr.msk.bf16.gmra.mrb[8].mxu0 %vm800_vm8, %v1836_v34  ;;  %v753_v37 = vpop.permute.xlu0 %752 }
 0x2c4   : > { %875 = vmatprep.mubr.bf16.mxu0 %v2210_v5 }
 0x2c6   : > { %v768_v21 = vpop.permute.xlu1 %767 }
 0x2c7   : > { %v763_v38 = vpop.permute.xlu0 %762 }
 0x2ca   : > { %v773_v34 = vpop.permute.xlu1 %772 }
 0x2cb   : > { %1585 = vmatmul.mubr.msk.bf16.gmra.mrb[12].mxu0 %vm800_vm8, %v1837_v35  ;;  %v1826_v39 = vpop.permute.xlu0 %1825 }
 0x2cc   : > { %v2729_v40 = vunpack.i.h.bf16 %v1826_v39  ;;  %v1827_v41 = vunpack.i.l.bf16 %v1826_v39 }
 0x2ce   : > { %v2733_v44 = vsel %vm548_vm0, %v1827_v41, %v2729_v40 }
 0x386   : > { %v847_v42 = vpop.f32.mrb[0].mxu0 }
 0x387   : > { %v848_v43 = vadd.f32 %v847_v42, %v743_v36  ;;  %v849_v46 = vpop.f32.mrb[1].mxu0  ;;  %v778_v42 = vpop.permute.xlu0 %777 }
 0x388   : > { %v850_v48 = vadd.f32 %v849_v46, %v743_v36  ;;  %v851_v51 = vpop.f32.mrb[2].mxu0 }
 0x389   : > { %v886_v52 = vmax.f32 %v848_v43, 0.0  ;;  %v852_v53 = vadd.f32 %v851_v51, %v748_v47  ;;  %v853_v54 = vpop.f32.mrb[3].mxu0 }
 0x38a   : > { %v887_v55 = vmax.f32 %v850_v48, 0.0  ;;  %v854_v56 = vadd.f32 %v853_v54, %v748_v47 }
 0x38b   : > { %v888_v57 = vmax.f32 %v852_v53, 0.0  ;;  %v911_v59 = vmul.f32 %v2733_v44, %v886_v52 }
 0x38c   : > { %v889_v58 = vmax.f32 %v854_v56, 0.0  ;;  %v912_v61 = vmul.f32 %v2729_v40, %v887_v55 }
 0x38d   : > { %v913_v60 = vmul.f32 %v2733_v44, %v888_v57 }
 0x38e   : > { %v914_v62 = vmul.f32 %v2729_v40, %v889_v58  ;;  %v857_v18 = vpop.f32.mrb[4].mxu0 }
 0x38f   : > { %v2739_v63 = vpack.c.bf16 %v913_v60, %v911_v59  ;;  %v858_v0 = vadd.f32 %v857_v18, %v753_v37  ;;  %v859_v1 = vpop.f32.mrb[5].mxu0  ;;  %v1007_v18 = vld [vmem:[#allocation13] sm:$0xff] }
 0x390   : > { %v860_v3 = vadd.f32 %v859_v1, %v753_v37  ;;  %v861_v17 = vpop.f32.mrb[6].mxu0  ;;  %v2741_v45 = vpack.c.bf16 %v914_v62, %v912_v61  ;;  %v1010_v1 = vld [vmem:[#allocation13 + $0x18] sm:$0xff] }
 0x391   : > { %v890_v4 = vmax.f32 %v858_v0, 0.0  ;;  %v862_v6 = vadd.f32 %v861_v17, %v758_v2  ;;  %v863_v50 = vpop.f32.mrb[7].mxu0  ;;  %943 = vrot.lane.b32.xlu1 %v2739_v63, %s2211_s13  ;;  %1201 = vmatpush1.bf16.msra.mxu0 %v2739_v63  ;;  %v1009_v0 = vld [vmem:[#allocation13 + $0x10] sm:$0xff] }
 0x392   : > { %v891_v7 = vmax.f32 %v860_v3, 0.0  ;;  %v864_v8 = vadd.f32 %v863_v50, %v758_v2  ;;  %1628 = vmatpush1.bf16.msra.mxu1 %v2739_v63  ;;  %945 = vrot.lane.b32.xlu0 %v2741_v45, %s2211_s13  ;;  %v1011_v2 = vld [vmem:[#allocation13 + $0x20] sm:$0xff]  ;;  %v1012_v3 = vld [vmem:[#allocation13 + $0x28] sm:$0xff]  ;;  %v1013_v17 = vld [vmem:[#allocation13 + $0x30] sm:$0xff] }
 0x393   : > { %v892_v9 = vmax.f32 %v862_v6, 0.0  ;;  %1202 = vmatprep.subr.bf16.mxu0 %v2210_v5  ;;  %1617 = vmatprep.subr.bf16.mxu1 %v2210_v5  ;;  %v915_v10 = vmul.f32 %v2733_v44, %v890_v4  ;;  %v1015_v4 = vld [vmem:[#allocation13 + $0x40] sm:$0xff]  ;;  %v1016_v6 = vld [vmem:[#allocation13 + $0x48] sm:$0xff]  ;;  %v1017_v50 = vld [vmem:[#allocation13 + $0x50] sm:$0xff] }
 0x394   : > { %v893_v49 = vmax.f32 %v864_v8, 0.0  ;;  %v916_v12 = vmul.f32 %v2729_v40, %v891_v7  ;;  %v1018_v7 = vld [vmem:[#allocation13 + $0x58] sm:$0xff]  ;;  %v1019_v8 = vld [vmem:[#allocation13 + $0x60] sm:$0xff] }
 0x395   : > { %v917_v11 = vmul.f32 %v2733_v44, %v892_v9  ;;  %v1020_v9 = vld [vmem:[#allocation13 + $0x68] sm:$0xff] }
 0x396   : > { %v918_v13 = vmul.f32 %v2729_v40, %v893_v49  ;;  %v867_v14 = vpop.f32.mrb[8].mxu0  ;;  %v1021_v49 = vld [vmem:[#allocation13 + $0x70] sm:$0xff] }
 0x397   : > { %v2755_v15 = vpack.c.bf16 %v917_v11, %v915_v10  ;;  %v868_v19 = vadd.f32 %v867_v14, %v763_v38  ;;  %v869_v20 = vpop.f32.mrb[9].mxu0  ;;  %v1022_v10 = vld [vmem:[#allocation13 + $0x78] sm:$0xff] }
 0x398   : > { %v870_v22 = vadd.f32 %v869_v20, %v763_v38  ;;  %v871_v23 = vpop.f32.mrb[10].mxu0  ;;  %v930_v24 = vpack.c.bf16 %v918_v13, %v916_v12 }
 0x399   : > { %v894_v25 = vmax.f32 %v868_v19, 0.0  ;;  %v872_v26 = vadd.f32 %v871_v23, %v768_v21  ;;  %v873_v27 = vpop.f32.mrb[11].mxu0  ;;  %947 = vrot.lane.b32.xlu1 %v2755_v15, %s2211_s13  ;;  %1203 = vmatpush1.bf16.msra.mxu0 %v2755_v15 }
 0x39a   : > { %v895_v28 = vmax.f32 %v870_v22, 0.0  ;;  %v874_v29 = vadd.f32 %v873_v27, %v768_v21  ;;  %1629 = vmatpush1.bf16.msra.mxu1 %v2755_v15  ;;  %949 = vrot.lane.b32.xlu0 %v930_v24, %s2211_s13 }
 0x39b   : > { %v896_v30 = vmax.f32 %v872_v26, 0.0  ;;  %1204 = vmatprep.subr.bf16.mxu0 %v2210_v5  ;;  %1618 = vmatprep.subr.bf16.mxu1 %v2210_v5  ;;  %v919_v32 = vmul.f32 %v2733_v44, %v894_v25 }
 0x39c   : > { %v897_v31 = vmax.f32 %v874_v29, 0.0  ;;  %v920_v35 = vmul.f32 %v2729_v40, %v895_v28 }
 0x39d   : > { %v921_v33 = vmul.f32 %v2733_v44, %v896_v30 }
 0x39e   : > { %v922_v36 = vmul.f32 %v2729_v40, %v897_v31  ;;  %v877_v37 = vpop.f32.mrb[12].mxu0 }
 0x39f   : > { %v931_v38 = vpack.c.bf16 %v921_v33, %v919_v32  ;;  %v878_v39 = vadd.f32 %v877_v37, %v773_v34  ;;  %v879_v41 = vpop.f32.mrb[13].mxu0  ;;  %v1838_v37 = vld [vmem:[#allocation11] ss:$8 sps:$4 sm:$0xff]  }
 0x3a0   : > { %v880_v43 = vadd.f32 %v879_v41, %v773_v34  ;;  %v881_v46 = vpop.f32.mrb[14].mxu0  ;;  %v932_v47 = vpack.c.bf16 %v922_v36, %v920_v35  ;;  %v1846_v41 = vld [vmem:[#allocation11 + $0x34] ss:$8 sps:$4 sm:$0xff]  }
 0x3a1   : > { %v898_v48 = vmax.f32 %v878_v39, 0.0  ;;  %v882_v51 = vadd.f32 %v881_v46, %v778_v42  ;;  %v883_v52 = vpop.f32.mrb[15].mxu0  ;;  %951 = vrot.lane.b32.xlu1 %v931_v38, %s2211_s13  ;;  %1205 = vmatpush1.bf16.msra.mxu0 %v931_v38  ;;  %v1844_v39 = vld [vmem:[#allocation11 + $0x14] ss:$8 sps:$4 sm:$0xff]   ;;  %v1850_v46 = vld [vmem:[#allocation11 + $0x44] ss:$8 sps:$4 sm:$0xff]  }
 0x3a2   : > { %v899_v53 = vmax.f32 %v880_v43, 0.0  ;;  %v884_v54 = vadd.f32 %v883_v52, %v778_v42  ;;  %1630 = vmatpush1.bf16.msra.mxu1 %v931_v38  ;;  %953 = vrot.lane.b32.xlu0 %v932_v47, %s2211_s13  ;;  %v1848_v42 = vld [vmem:[#allocation11 + $0x10] ss:$8 sps:$4 sm:$0xff]   ;;  %v1858_v52 = vld [vmem:[#allocation11 + $0x60] ss:$8 sps:$4 sm:$0xff]  }
 0x3a3   : > { %v900_v55 = vmax.f32 %v882_v51, 0.0  ;;  %1206 = vmatprep.subr.bf16.mxu0 %v2210_v5  ;;  %1619 = vmatprep.subr.bf16.mxu1 %v2210_v5  ;;  %v923_v57 = vmul.f32 %v2733_v44, %v898_v48  ;;  %v1849_v43 = vld [vmem:[#allocation11 + $0x30] ss:$8 sps:$4 sm:$0xff]   ;;  %v1856_v51 = vld [vmem:[#allocation11 + $0x64] ss:$8 sps:$4 sm:$0xff]  }
 0x3a4   : > { %v901_v56 = vmax.f32 %v884_v54, 0.0  ;;  %v924_v59 = vmul.f32 %v2729_v40, %v899_v53  ;;  %v1855_v48 = vld [vmem:[#allocation11 + $0x50] ss:$8 sps:$4 sm:$0xff]   ;;  %v1859_v53 = vld [vmem:[#allocation11 + $0x74] ss:$8 sps:$4 sm:$0xff]  }
 0x3a5   : > { %v925_v58 = vmul.f32 %v2733_v44, %v900_v55  ;;  %v1840_v44 = vld [vmem:[#allocation11 + $0x4] ss:$8 sps:$4 sm:$0xff]   ;;  %v1861_v54 = vld [vmem:[#allocation11 + $0x70] ss:$8 sps:$4 sm:$0xff]  }
 0x3a6   : > { %v926_v60 = vmul.f32 %v2729_v40, %v901_v56  ;;  %v1843_v40 = vld [vmem:[#allocation11 + $0x24] ss:$8 sps:$4 sm:$0xff]   ;;  %1602 = vmatprep.mubr.msk.bf16.mxu0 %vm1175_vm9, %v1840_v44 }
 0x3a7   : > { %v933_v61 = vpack.c.bf16 %v925_v58, %v923_v57  ;;  %1604 = vmatprep.mubr.msk.bf16.mxu1 %vm1175_vm9, %v1843_v40 }
 0x3a8   : > { %v934_v62 = vpack.c.bf16 %v926_v60, %v924_v59 }
 0x3a9   : > { %955 = vrot.lane.b32.xlu1 %v933_v61, %s2211_s13  ;;  %1207 = vmatpush1.bf16.msra.mxu0 %v933_v61 }
 0x3aa   : > { %1631 = vmatpush1.bf16.msra.mxu1 %v933_v61  ;;  %957 = vrot.lane.b32.xlu0 %v934_v62, %s2211_s13  ;;  %s2214_s13 = smov [#allocation14]  }
 0x3ab   : > { %1208 = vmatprep.subr.bf16.mxu0 %v2210_v5  ;;  %1620 = vmatprep.subr.bf16.mxu1 %v2210_v5 }
 0x3ad   : > { %967 = vrot.lane.b32.xlu1 %v2739_v63, %s2212_s14  ;;  %v1008_v63 = vld [vmem:[#allocation13 + $0x8] sm:$0xff] }
 0x3ae   : > { %969 = vrot.lane.b32.xlu0 %v2741_v45, %s2212_s14  ;;  %v1014_v45 = vld [vmem:[#allocation13 + $0x38] sm:$0xff] }
 0x3b1   : > { %971 = vrot.lane.b32.xlu1 %v2755_v15, %s2212_s14 }
 0x3b2   : > { %973 = vrot.lane.b32.xlu0 %v930_v24, %s2212_s14 }
 0x3b5   : > { %975 = vrot.lane.b32.xlu1 %v931_v38, %s2212_s14  ;;  %v1841_v38 = vld [vmem:[#allocation11 + $0x20] ss:$8 sps:$4 sm:$0xff]  }
 0x3b6   : > { %977 = vrot.lane.b32.xlu0 %v932_v47, %s2212_s14  ;;  %v1853_v47 = vld [vmem:[#allocation11 + $0x54] ss:$8 sps:$4 sm:$0xff]  }
 0x3b9   : > { %979 = vrot.lane.b32.xlu1 %v933_v61, %s2212_s14 }
 0x3ba   : > { %981 = vrot.lane.b32.xlu0 %v934_v62, %s2212_s14 }
 0x3bd   : > { %1025 = vperm.xlu1 %1822, %v1007_v18  }
 0x3be   : > { %1030 = vperm.xlu0 %1823, %v1008_v63  }
 0x3c1   : > { %1035 = vperm.xlu1 %1822, %v1009_v0  }
 0x3c2   : > { %1040 = vperm.xlu0 %1823, %v1010_v1  }
 0x3c5   : > { %1045 = vperm.xlu1 %1822, %v1011_v2  }
 0x3c6   : > { %1050 = vperm.xlu0 %1823, %v1012_v3  }
 0x3c9   : > { %1055 = vperm.xlu1 %1822, %v1013_v17  }
 0x3ca   : > { %1060 = vperm.xlu0 %1823, %v1014_v45  }
 0x3cd   : > { %1065 = vperm.xlu1 %1822, %v1015_v4  }
 0x3ce   : > { %1070 = vperm.xlu0 %1823, %v1016_v6  }
 0x3d1   : > { %1075 = vperm.xlu1 %1822, %v1017_v50  }
 0x3d2   : > { %1080 = vperm.xlu0 %1823, %v1018_v7  }
 0x3d5   : > { %1085 = vperm.xlu1 %1822, %v1019_v8  }
 0x3d6   : > { %1090 = vperm.xlu0 %1823, %v1020_v9  }
 0x3d9   : > { %1095 = vperm.xlu1 %1822, %v1021_v49  }
 0x3da   : > { %1100 = vperm.xlu0 %1823, %v1022_v10  }
 0x3dd   : > { %1830 = vrot.lane.b32.xlu1 %v2717_v16, %s2212_s14  ;;  %s2064_s14 = sshll.u32 %s2214_s13, 4  ;;  %s2065_s14 = int_to_ptr.vmem [resolvable:$false] %s2064_s14 }
 0x3de   : > { %s2066_s17 = scalar_lea.vmem %s2065_s14, 4096  ;;  %p2067_p7 = scmp.lt.s32.totalorder %s2891_s8, %s2065_s14 }
 0x3df   : > { %p2068_p1 = scmp.lt.s32.totalorder %s2066_s17, %s2060_s19 }
 0x3e1   : > { %p2069_p6 = por %p2068_p1, %p2067_p7 }
 0x3e3   : > { %p2070_p9 = pnand %p2069_p6, %p2063_p4 }
 0x403   : > { %v944_v11 = vpop.permute.xlu1 %943 }
 0x404   : > { %v946_v12 = vpop.permute.xlu0 %945 }
 0x405   : > { %v959_v13 = vsel %vm548_vm0, %v944_v11, %v946_v12 }
 0x406   : > { %1209 = vmatpush1.bf16.msra.mxu0 %v959_v13  ;;  %1632 = vmatpush1.bf16.msra.mxu1 %v959_v13 }
 0x407   : > { %1210 = vmatprep.subr.bf16.mxu0 %v2210_v5  ;;  %1621 = vmatprep.subr.bf16.mxu1 %v2210_v5 }
 0x40b   : > { %v948_v14 = vpop.permute.xlu1 %947 }
 0x40c   : > { %v950_v15 = vpop.permute.xlu0 %949 }
 0x40d   : > { %v960_v19 = vsel %vm548_vm0, %v948_v14, %v950_v15  ;;  %v1335_v14 = vld [vmem:[%s2600_s1] sm:$0xff] }
 0x40e   : > { %1211 = vmatpush1.bf16.msra.mxu0 %v960_v19  ;;  %1633 = vmatpush1.bf16.msra.mxu1 %v960_v19  ;;  %v1339_v15 = vld [vmem:[%s2600_s1 + $0x20] sm:$0xff] }
 0x40f   : > { %1212 = vmatprep.subr.bf16.mxu0 %v2210_v5  ;;  %1622 = vmatprep.subr.bf16.mxu1 %v2210_v5 }
 0x413   : > { %v952_v16 = vpop.permute.xlu1 %951 }
 0x414   : > { %v954_v20 = vpop.permute.xlu0 %953 }
 0x415   : > { %v961_v21 = vsel %vm548_vm0, %v952_v16, %v954_v20 }
 0x416   : > { %1213 = vmatpush1.bf16.msra.mxu0 %v961_v21  ;;  %1634 = vmatpush1.bf16.msra.mxu1 %v961_v21 }
 0x417   : > { %1214 = vmatprep.subr.bf16.mxu0 %v2210_v5  ;;  %1623 = vmatprep.subr.bf16.mxu1 %v2210_v5 }
 0x41b   : > { %v956_v22 = vpop.permute.xlu1 %955 }
 0x41c   : > { %v958_v23 = vpop.permute.xlu0 %957 }
 0x41d   : > { %v962_v24 = vsel %vm548_vm0, %v956_v22, %v958_v23  ;;  %v1336_v22 = vld [vmem:[%s2600_s1 + $0x8] sm:$0xff] }
 0x41e   : > { %1215 = vmatpush1.bf16.msra.mxu0 %v962_v24  ;;  %1635 = vmatpush1.bf16.msra.mxu1 %v962_v24  ;;  %v1340_v23 = vld [vmem:[%s2600_s1 + $0x28] sm:$0xff] }
 0x41f   : > { %v968_v25 = vpop.permute.xlu1 %967  ;;  %1216 = vmatprep.subr.bf16.mxu0 %v2210_v5  ;;  %1624 = vmatprep.subr.bf16.mxu1 %v2210_v5 }
 0x420   : > { %v970_v26 = vpop.permute.xlu0 %969 }
 0x421   : > { %v983_v27 = vsel %vm617_vm1, %v968_v25, %v970_v26 }
 0x422   : > { %1217 = vmatpush1.bf16.msra.mxu0 %v983_v27  ;;  %1636 = vmatpush1.bf16.msra.mxu1 %v983_v27 }
 0x423   : > { %v972_v28 = vpop.permute.xlu1 %971  ;;  %1218 = vmatprep.subr.bf16.mxu0 %v2210_v5  ;;  %1625 = vmatprep.subr.bf16.mxu1 %v2210_v5 }
 0x424   : > { %v974_v29 = vpop.permute.xlu0 %973 }
 0x425   : > { %v984_v30 = vsel %vm617_vm1, %v972_v28, %v974_v29 }
 0x426   : > { %1219 = vmatpush1.bf16.msra.mxu0 %v984_v30  ;;  %1637 = vmatpush1.bf16.msra.mxu1 %v984_v30 }
 0x427   : > { %v976_v31 = vpop.permute.xlu1 %975  ;;  %1220 = vmatprep.subr.bf16.mxu0 %v2210_v5  ;;  %1626 = vmatprep.subr.bf16.mxu1 %v2210_v5 }
 0x428   : > { %v978_v32 = vpop.permute.xlu0 %977 }
 0x429   : > { %v985_v33 = vsel %vm617_vm1, %v976_v31, %v978_v32 }
 0x42a   : > { %1221 = vmatpush1.bf16.msra.mxu0 %v985_v33  ;;  %1638 = vmatpush1.bf16.msra.mxu1 %v985_v33 }
 0x42b   : > { %v980_v34 = vpop.permute.xlu1 %979  ;;  %1222 = vmatprep.subr.bf16.mxu0 %v2210_v5  ;;  %1627 = vmatprep.subr.bf16.mxu1 %v2210_v5  ;;  %v1852_v5 = vld [vmem:[#allocation11 + $0x40] ss:$8 sps:$4 sm:$0xff]  }
 0x42c   : > { %v982_v35 = vpop.permute.xlu0 %981 }
 0x42d   : > { %v986_v36 = vsel %vm617_vm1, %v980_v34, %v982_v35 }
 0x42e   : > { %1223 = vmatpush1.bf16.msra.mxu0 %v986_v36  ;;  %1639 = vmatpush1.bf16.msra.mxu1 %v986_v36 }
 0x431   : > { %1233 = vmatmul.mubr.bf16.vlgmr.msra.gmra.mrb[16].mxu0 %v1838_v37  ;;  %1249 = vmatmul.mubr.bf16.vlgmr.msra.gmra.mrb[0].mxu1 %v1841_v38 }
 0x432   : > { %1603 = vmatprep.mubr.msk.bf16.mxu0 %vm1175_vm9, %v1844_v39  ;;  %1605 = vmatprep.mubr.msk.bf16.mxu1 %vm1175_vm9, %v1846_v41 }
 0x439   : > { %1241 = vmatmul.mubr.bf16.gmra.mrb[20].mxu0 %v1848_v42  ;;  %1257 = vmatmul.mubr.bf16.gmra.mrb[4].mxu1 %v1849_v43 }
 0x43a   : > { %1606 = vmatprep.mubr.msk.bf16.mxu1 %vm1175_vm9, %v1850_v46 }
 0x43c   : > { %v1026_v55 = vpop.permute.xlu1 %1025 }
 0x43d   : > { %v1031_v62 = vpop.permute.xlu0 %1030 }
 0x440   : > { %v1036_v56 = vpop.permute.xlu1 %1035 }
 0x441   : > { %1265 = vmatmul.mubr.bf16.gmra.mrb[8].mxu1 %v1852_v5  ;;  %v1041_v40 = vpop.permute.xlu0 %1040 }
 0x442   : > { %1607 = vmatprep.mubr.msk.bf16.mxu1 %vm1175_vm9, %v1853_v47  ;;  %v1337_v47 = vld [vmem:[%s2600_s1 + $0x10] sm:$0xff] }
 0x444   : > { %v1046_v57 = vpop.permute.xlu1 %1045 }
 0x445   : > { %v1051_v1 = vpop.permute.xlu0 %1050 }
 0x448   : > { %v1056_v58 = vpop.permute.xlu1 %1055 }
 0x449   : > { %1273 = vmatmul.mubr.bf16.gmra.mrb[12].mxu1 %v1855_v48  ;;  %v1061_v24 = vpop.permute.xlu0 %1060  ;;  %v1341_v48 = vld [vmem:[%s2600_s1 + $0x30] sm:$0xff] }
 0x44a   : > { %1608 = vmatprep.mubr.msk.bf16.mxu1 %vm1175_vm9, %v1856_v51 }
 0x44c   : > { %v2823_v59 = vpop.permute.xlu1 %1065 }
 0x450   : > { %v2825_v60 = vpop.permute.xlu1 %1075 }
 0x451   : > { %1281 = vmatmul.mubr.bf16.gmra.mrb[16].mxu1 %v1858_v52 }
 0x452   : > { %1609 = vmatprep.mubr.msk.bf16.mxu1 %vm1175_vm9, %v1859_v53 }
 0x454   : > { %v2827_v61 = vpop.permute.xlu1 %1085 }
 0x458   : > { %v2829_v44 = vpop.permute.xlu1 %1095 }
 0x459   : > { %1289 = vmatmul.mubr.bf16.gmra.mrb[20].mxu1 %v1861_v54 }
 0x45c   : > { %v1831_v18 = vpop.permute.xlu1 %1830 }
 0x45d   : > { %v1833_v63 = vunpack.i.h.bf16 %v1831_v18  ;;  %v1832_v0 = vunpack.i.l.bf16 %v1831_v18 }
 0x45f   : > { %v2832_v50 = vsel %vm617_vm1, %v1832_v0, %v1833_v63 }
 0x504   : > { %v1234_v2 = vpop.f32.mrb[16].mxu0  ;;  %v1250_v3 = vpop.f32.mrb[0].mxu1 }
 0x505   : > { %v1235_v17 = vadd.f32 %v1234_v2, %v1026_v55  ;;  %v1251_v45 = vadd.f32 %v1250_v3, %v1046_v57  ;;  %v1236_v4 = vpop.f32.mrb[17].mxu0  ;;  %v1252_v6 = vpop.f32.mrb[1].mxu1  ;;  %v1338_v55 = vld [vmem:[%s2600_s1 + $0x18] sm:$0xff] }
 0x506   : > { %v1237_v7 = vpop.f32.mrb[18].mxu0  ;;  %v1253_v8 = vpop.f32.mrb[2].mxu1 }
 0x507   : > { %v1297_v9 = vmax.f32 %v1235_v17, 0.0  ;;  %v1301_v49 = vmax.f32 %v1251_v45, 0.0  ;;  %v1238_v10 = vadd.f32 %v1237_v7, %v1031_v62  ;;  %v1254_v11 = vadd.f32 %v1253_v8, %v1051_v1  ;;  %v1255_v12 = vpop.f32.mrb[3].mxu1  ;;  %v1239_v13 = vpop.f32.mrb[19].mxu0  ;;  %v1343_v7 = vld [vmem:[%s2600_s1 + $0x40] sm:$0xff] }
 0x508   : > { %v1071_v3 = vpop.permute.xlu0 %1070 }
 0x509   : > { %v1319_v19 = vmul.f32 %v2832_v50, %v1297_v9  ;;  %v1323_v16 = vmul.f32 %v2832_v50, %v1301_v49  ;;  %v1298_v20 = vmax.f32 %v1238_v10, 0.0  ;;  %v1302_v21 = vmax.f32 %v1254_v11, 0.0  ;;  %v1344_v49 = vld [vmem:[%s2600_s1 + $0x48] sm:$0xff] }
 0x50b   : > { %v1351_v25 = vadd.f32 %v1335_v14, %v1319_v19  ;;  %v1355_v26 = vadd.f32 %v1339_v15, %v1323_v16  ;;  %v1320_v27 = vmul.f32 %v2832_v50, %v1298_v20  ;;  %v1324_v28 = vmul.f32 %v2832_v50, %v1302_v21 }
 0x50c   : > { %v1242_v29 = vpop.f32.mrb[20].mxu0  ;;  %v1258_v30 = vpop.f32.mrb[4].mxu1 }
 0x50d   : > { %1367 = vst [vmem:[%s2600_s1] sm:$0xff] %v1351_v25  ;;  %1371 = vst [vmem:[%s2600_s1 + $0x20] sm:$0xff] %v1355_v26  ;;  %v1352_v31 = vadd.f32 %v1336_v22, %v1320_v27  ;;  %v1356_v32 = vadd.f32 %v1340_v23, %v1324_v28  ;;  %v1243_v33 = vadd.f32 %v1242_v29, %v1036_v56  ;;  %v1244_v35 = vpop.f32.mrb[21].mxu0  ;;  %v1260_v36 = vpop.f32.mrb[5].mxu1  ;;  %v1342_v56 = vld [vmem:[%s2600_s1 + $0x38] sm:$0xff]  ;;  %v1345_v22 = vld [vmem:[%s2600_s1 + $0x50] sm:$0xff] }
 0x50e   : > { %v1259_v34 = vadd.f32 %v1258_v30, %v1056_v58  ;;  %v1245_v37 = vpop.f32.mrb[22].mxu0  ;;  %v1261_v38 = vpop.f32.mrb[6].mxu1  ;;  %v1346_v25 = vld [vmem:[%s2600_s1 + $0x58] sm:$0xff]  ;;  %v1347_v36 = vld [vmem:[%s2600_s1 + $0x60] sm:$0xff] }
 0x50f   : > { %1368 = vst [vmem:[%s2600_s1 + $0x8] sm:$0xff] %v1352_v31  ;;  %1372 = vst [vmem:[%s2600_s1 + $0x28] sm:$0xff] %v1356_v32  ;;  %v1299_v39 = vmax.f32 %v1243_v33, 0.0  ;;  %v1246_v42 = vadd.f32 %v1245_v37, %v1041_v40  ;;  %v1262_v43 = vadd.f32 %v1261_v38, %v1061_v24  ;;  %v1263_v46 = vpop.f32.mrb[7].mxu1  ;;  %v1247_v5 = vpop.f32.mrb[23].mxu0 }
 0x510   : > { %v1303_v41 = vmax.f32 %v1259_v34, 0.0  ;;  %v1081_v15 = vpop.permute.xlu0 %1080 }
 0x511   : > { %v1321_v51 = vmul.f32 %v2832_v50, %v1299_v39  ;;  %v1300_v53 = vmax.f32 %v1246_v42, 0.0  ;;  %v1304_v54 = vmax.f32 %v1262_v43, 0.0  ;;  %v1348_v39 = vld [vmem:[%s2600_s1 + $0x68] sm:$0xff] }
 0x512   : > { %v1325_v52 = vmul.f32 %v2832_v50, %v1303_v41 }
 0x513   : > { %v1353_v57 = vadd.f32 %v1337_v47, %v1321_v51  ;;  %v1322_v62 = vmul.f32 %v2832_v50, %v1300_v53  ;;  %v1326_v40 = vmul.f32 %v2832_v50, %v1304_v54  ;;  %v1349_v54 = vld [vmem:[%s2600_s1 + $0x70] sm:$0xff] }
 0x514   : > { %v1357_v58 = vadd.f32 %v1341_v48, %v1325_v52  ;;  %v1266_v18 = vpop.f32.mrb[8].mxu1  ;;  %v1091_v31 = vpop.permute.xlu0 %1090 }
 0x515   : > { %1369 = vst [vmem:[%s2600_s1 + $0x10] sm:$0xff] %v1353_v57  ;;  %v1354_v63 = vadd.f32 %v1338_v55, %v1322_v62  ;;  %v1358_v0 = vadd.f32 %v1342_v56, %v1326_v40  ;;  %v1267_v1 = vadd.f32 %v1266_v18, %v2823_v59  ;;  %v1268_v2 = vpop.f32.mrb[9].mxu1  ;;  %v1350_v57 = vld [vmem:[%s2600_s1 + $0x78] sm:$0xff] }
 0x516   : > { %1373 = vst [vmem:[%s2600_s1 + $0x30] sm:$0xff] %v1357_v58  ;;  %v1269_v17 = vpop.f32.mrb[10].mxu1 }
 0x517   : > { %1370 = vst [vmem:[%s2600_s1 + $0x18] sm:$0xff] %v1354_v63  ;;  %1374 = vst [vmem:[%s2600_s1 + $0x38] sm:$0xff] %v1358_v0  ;;  %v1305_v45 = vmax.f32 %v1267_v1, 0.0  ;;  %v1270_v4 = vadd.f32 %v1269_v17, %v1071_v3  ;;  %v1271_v6 = vpop.f32.mrb[11].mxu1 }
 0x518   : > { %v1101_v47 = vpop.permute.xlu0 %1100 }
 0x519   : > { %v1327_v8 = vmul.f32 %v2832_v50, %v1305_v45  ;;  %v1306_v9 = vmax.f32 %v1270_v4, 0.0 }
 0x51b   : > { %v1359_v10 = vadd.f32 %v1343_v7, %v1327_v8  ;;  %v1328_v59 = vmul.f32 %v2832_v50, %v1306_v9 }
 0x51c   : > { %v1274_v11 = vpop.f32.mrb[12].mxu1 }
 0x51d   : > { %1375 = vst [vmem:[%s2600_s1 + $0x40] sm:$0xff] %v1359_v10  ;;  %v1360_v12 = vadd.f32 %v1344_v49, %v1328_v59  ;;  %v1275_v13 = vadd.f32 %v1274_v11, %v2825_v60  ;;  %v1276_v14 = vpop.f32.mrb[13].mxu1 }
 0x51e   : > { %v1277_v19 = vpop.f32.mrb[14].mxu1 }
 0x51f   : > { %1376 = vst [vmem:[%s2600_s1 + $0x48] sm:$0xff] %v1360_v12  ;;  %v1307_v16 = vmax.f32 %v1275_v13, 0.0  ;;  %v1278_v20 = vadd.f32 %v1277_v19, %v1081_v15  ;;  %v1279_v21 = vpop.f32.mrb[15].mxu1 }
 0x521   : > { %v1329_v23 = vmul.f32 %v2832_v50, %v1307_v16  ;;  %v1308_v24 = vmax.f32 %v1278_v20, 0.0 }
 0x523   : > { %v1361_v26 = vadd.f32 %v1345_v22, %v1329_v23  ;;  %v1330_v27 = vmul.f32 %v2832_v50, %v1308_v24 }
 0x524   : > { %v1282_v28 = vpop.f32.mrb[16].mxu1 }
 0x525   : > { %1377 = vst [vmem:[%s2600_s1 + $0x50] sm:$0xff] %v1361_v26  ;;  %v1362_v60 = vadd.f32 %v1346_v25, %v1330_v27  ;;  %v1283_v29 = vadd.f32 %v1282_v28, %v2827_v61  ;;  %v1284_v30 = vpop.f32.mrb[17].mxu1 }
 0x526   : > { %v1285_v32 = vpop.f32.mrb[18].mxu1 }
 0x527   : > { %1378 = vst [vmem:[%s2600_s1 + $0x58] sm:$0xff] %v1362_v60  ;;  %v1309_v33 = vmax.f32 %v1283_v29, 0.0  ;;  %v1286_v34 = vadd.f32 %v1285_v32, %v1091_v31  ;;  %v1287_v35 = vpop.f32.mrb[19].mxu1 }
 0x529   : > { %v1331_v37 = vmul.f32 %v2832_v50, %v1309_v33  ;;  %v1310_v38 = vmax.f32 %v1286_v34, 0.0 }
 0x52b   : > { %v1363_v41 = vadd.f32 %v1347_v36, %v1331_v37  ;;  %v1332_v42 = vmul.f32 %v2832_v50, %v1310_v38 }
 0x52c   : > { %v1290_v61 = vpop.f32.mrb[20].mxu1 }
 0x52d   : > { %1379 = vst [vmem:[%s2600_s1 + $0x60] sm:$0xff] %v1363_v41  ;;  %v1364_v43 = vadd.f32 %v1348_v39, %v1332_v42  ;;  %v1291_v46 = vadd.f32 %v1290_v61, %v2829_v44  ;;  %v1292_v5 = vpop.f32.mrb[21].mxu1 }
 0x52e   : > { %v1293_v48 = vpop.f32.mrb[22].mxu1 }
 0x52f   : > { %1380 = vst [vmem:[%s2600_s1 + $0x68] sm:$0xff] %v1364_v43  ;;  %v1311_v51 = vmax.f32 %v1291_v46, 0.0  ;;  %v1294_v52 = vadd.f32 %v1293_v48, %v1101_v47  ;;  %v1295_v53 = vpop.f32.mrb[23].mxu1 }
 0x531   : > { %v1333_v55 = vmul.f32 %v2832_v50, %v1311_v51  ;;  %v1312_v56 = vmax.f32 %v1294_v52, 0.0 }
 0x533   : > { %v1365_v58 = vadd.f32 %v1349_v54, %v1333_v55  ;;  %v1334_v44 = vmul.f32 %v2832_v50, %v1312_v56 }
 0x535   : > { %1381 = vst [vmem:[%s2600_s1 + $0x70] sm:$0xff] %v1365_v58  ;;  %v1366_v62 = vadd.f32 %v1350_v57, %v1334_v44 }
 0x537   : > { %1382 = vst [vmem:[%s2600_s1 + $0x78] sm:$0xff] %v1366_v62 }
 0x538   : > { %2073 = shalt.err (!%p2070_p9)
}
 0x539   : > { %s2074_s5 = scalar_lea.hbm %s2889_s2, 2048  ;;  %s2078_s16 = scalar_lea.hbm %s3014_s20, 4096 }
 0x53a   : > { %p2075_p12 = scmp.ne.s32.totalorder %s2889_s2, %s2074_s5  ;;  %p2079_p11 = scmp.lt.u32.totalorder %s2889_s2, %s3014_s20 }
 0x53b   : > { %p2080_p2 = scmp.lt.u32.totalorder %s2078_s16, %s2074_s5  ;;  %p2082_p3 = scmp.lt.u32.totalorder %s2074_s5, %s2889_s2 }
 0x53c   : > { %p2076_p13 = pnand %p2075_p12, %p3015_p5 }
 0x53d   : > { %p2081_p10 = por %p2080_p2, %p2079_p11 }
 0x53e   : > { %p2077_p0 = pneg %p2076_p13 }
 0x53f   : > { %p2083_p8 = por %p2082_p3, %p2081_p10 }
 0x541   : > { %p2084_p4 = pnand %p2083_p8, %p2077_p0 }
 0x543   : > { %2087 = shalt.err (!%p2084_p4)
}
 0x544   : > { %s2215_s3 = smov 128   ;;  %s2216_s19 = smov 8  }
 0x545   : > { %1667 = dma.vmem_to_hbm [thread:$0]  (%p3015_p5), %s2891_s8, 2048, %s2889_s2, %s2897_s23, %s2215_s3, %s2215_s3, %s2216_s19  }
 0x546 PF: > { %p1709_p7 = scmp.ge.s32.totalorder %s2194_s11, 2  ;;  %s1414_s13 = sand.u32 1, %s2154_s24  }
 0x547   : > { %p3016_p1 = scmp.ne.s32.totalorder %s3005_s0, 0  ;;  %s1415_s14 = scalar_lea.sflag [#allocation4], %s1414_s13 }
 0x549   : > { %p1693_p6 = pnand %p1709_p7, %p3016_p1 }
 0x54b   : > { %2149 = dma.done.wait (!%p1693_p6), %s1415_s14, 2048  }
 0x54c   : > { %2151 = vsyncadd (!%p1693_p6), %s1415_s14, 4294965248  ;;  %s26_s11 = sadd.s32 1, %s2194_s11   ;;  %s3017_s24 = smov %s2158_s25 }
 0x54d   : > { %p23_p9 = scmp.ge.s32.totalorder %s26_s11, 8   ;;  %s3018_s25 = smov %s2162_s26 }
 0x54e   : > { %s3019_s26 = smov %s2521_s30  ;;  %s3020_s27 = smov %s2170_s28 }
 0x54f   : > { %s3021_s28 = smov %s2174_s29  ;;  %s3022_s29 = smov %s2524_s18 }
 0x550   : > { %s3023_s30 = smov %s2186_s9  ;;  %s3024_s8 = smov %s2190_s10 }
 0x551   : > { %s3025_s9 = smov %s3028_s15  ;;  %s3026_s10 = smov %s3032_s7 }
 0x552   :  { %25 = sbr.rel (!%p23_p9) target bundleno = 20 (0x14), region = 121 }
 0x559   :  { %1420 = vsyncpa [#allocation3], 1 }
 0x55a   :  { %1422 = vsyncpa [#allocation3 + $0x1], 1 }
 0x55b   :  { %1423 = vsyncpa [#allocation6], 1 }
 0x55c   :  { %1424 = vsyncpa [#allocation9], 1 }
 0x55d   :  { %1425 = vsyncpa [#allocation12], 1 }
 0x55e   :  { %1426 = vsyncpa [#allocation4], 1 }
 0x55f   :  { %1428 = vsyncpa [#allocation4 + $0x1], 1 }

</bundles_post_ra>
